<compile_context>
chip_gen: v5e
topology: v5e:2x2
jax: 0.10.0
libtpu: 0.0.40
codegen_flags: <defaults>
</compile_context>

<pallas_src>
import functools

import jax
import jax.numpy as jnp
from jax.experimental import pallas as pl
from jax.experimental.pallas import tpu as pltpu


# ---------------------------------------------------------------------------
# Fused kernel: all LSTM layers + final FC in one invocation.
# ---------------------------------------------------------------------------
def _fused_ili_lstm_kernel(*refs, num_layers, seq_len, batch, hidden_dim):
    H = hidden_dim
    G = 4 * H
    T = seq_len
    B = batch

    x_ref = refs[0]                               # (T*B, D_in)  time-major slab
    w_refs = refs[1:1 + 3 * num_layers]           # per layer: wih(_pad), whh_pad, bias
    fcw_ref = refs[1 + 3 * num_layers]            # (G, O)  zero rows [H:G)
    fcb_ref = refs[2 + 3 * num_layers]            # (1, O)
    out_ref = refs[3 + 3 * num_layers]            # (B, O)
    h_scratch = refs[4 + 3 * num_layers]          # VMEM (T*B, G) inter-layer slab

    # Lane mask (computed once, hoisted out of all loops): sigmoid for the
    # [i|f|o] lanes, tanh for the [g] lanes.
    sig_mask = jax.lax.broadcasted_iota(jnp.int32, (B, G), 1) < 3 * H

    h_wide = jnp.zeros((B, G), jnp.float32)
    for layer in range(num_layers):
        wih = w_refs[3 * layer][...]              # (D_l or G, G), cols [i,f,o,g]
        whh = w_refs[3 * layer + 1][...]          # (G, G), zero rows [H:G)
        b = w_refs[3 * layer + 2][...]            # (1, G)

        # Batched, off-critical-path input projection: ONE matmul per layer.
        x_all = x_ref[...] if layer == 0 else h_scratch[...]
        xw_all = jnp.dot(x_all, wih, preferred_element_type=jnp.float32) + b  # (T*B, G)

        c_wide = jnp.zeros((B, G), jnp.float32)
        h_wide = jnp.zeros((B, G), jnp.float32)
        for t in range(T):                        # static unroll over time
            # Only the recurrent matmul + elementwise update sit on the
            # serial critical path.
            gates = xw_all[t * B:(t + 1) * B, :] + jnp.dot(
                h_wide, whh, preferred_element_type=jnp.float32)     # (B, G)
            act = jnp.where(sig_mask, jax.nn.sigmoid(gates), jnp.tanh(gates))
            # XLU rolls align f/o/g with i's lanes [0:H).  Lanes [H:G) carry
            # bounded garbage that is annihilated by the zero-padded weight
            # rows in every downstream matmul.
            f_w = pltpu.roll(act, 3 * H, 1)
            o_w = pltpu.roll(act, 2 * H, 1)
            g_w = pltpu.roll(act, 1 * H, 1)
            c_wide = f_w * c_wide + act * g_w
            h_wide = o_w * jnp.tanh(c_wide)
            if layer < num_layers - 1:
                h_scratch[t * B:(t + 1) * B, :] = h_wide

    # Final Linear on the last timestep's hidden state (fused, zero-padded
    # fc weight rows make the wide-h usable directly).
    out = jnp.dot(h_wide, fcw_ref[...], preferred_element_type=jnp.float32) + fcb_ref[...]
    out_ref[...] = out.astype(out_ref.dtype)


# ---------------------------------------------------------------------------
# One-time parameter preparation:
#   * transpose, reorder gates [i,f,g,o] -> [i,f,o,g], fold the two biases,
#   * zero-row pad W_hh / layer>=1 W_ih / fc_w to 4H rows so the "wide"
#     (B, 4H) hidden state can feed the matmuls without lane slicing.
# ---------------------------------------------------------------------------
def prepare_params(params):
    H = params["lstm"][0]["w_hh"].shape[1]
    G = 4 * H
    perm = jnp.concatenate([jnp.arange(0, 2 * H),          # i, f
                            jnp.arange(3 * H, 4 * H),      # o
                            jnp.arange(2 * H, 3 * H)])     # g
    layers = []
    for idx, layer in enumerate(params["lstm"]):
        wih_t = jnp.asarray(layer["w_ih"], jnp.float32)[perm].T        # (D_l, G)
        whh_t = jnp.asarray(layer["w_hh"], jnp.float32)[perm].T        # (H, G)
        bias = (jnp.asarray(layer["b_ih"], jnp.float32)
                + jnp.asarray(layer["b_hh"], jnp.float32))[perm][None, :]  # (1, G)
        whh_pad = jnp.zeros((G, G), jnp.float32).at[:H].set(whh_t)
        if idx > 0:
            wih_t = jnp.zeros((G, G), jnp.float32).at[:H].set(wih_t)
        layers.append((wih_t, whh_pad, bias))
    fc_w_t = jnp.asarray(params["fc_w"], jnp.float32).T                # (H, O)
    fc_w_pad = jnp.zeros((G, fc_w_t.shape[1]), jnp.float32).at[:H].set(fc_w_t)
    fc_b = jnp.asarray(params["fc_b"], jnp.float32)[None, :]           # (1, O)
    return {"layers": layers, "fc_w_pad": fc_w_pad, "fc_b": fc_b}


# ---------------------------------------------------------------------------
# Forward pass: single fused pallas_call.
# ---------------------------------------------------------------------------
def ili_lstm_forward(x_btd, prepped):
    """x_btd: (B, T, input_dim) batch_first, like the PyTorch module."""
    x = jnp.asarray(x_btd, jnp.float32)
    B, T, D_in = x.shape
    B_pad = max(8, ((B + 7) // 8) * 8)        # fill vreg sublanes

    layers = prepped["layers"]
    num_layers = len(layers)
    G = layers[0][0].shape[1]                 # 4H
    H = G // 4
    O = prepped["fc_w_pad"].shape[1]

    # (B,T,D) -> time-major (T,B,D) -> pad batch -> single (T*B_pad, D) slab.
    x_tbd = jnp.transpose(x, (1, 0, 2))
    x_tbd = jnp.pad(x_tbd, ((0, 0), (0, B_pad - B), (0, 0)))
    x_2d = x_tbd.reshape(T * B_pad, D_in)

    flat_inputs = [x_2d]
    in_specs = [pl.BlockSpec((T * B_pad, D_in), lambda i: (0, 0))]
    for (wih, whh, bias) in layers:
        d_l = wih.shape[0]
        flat_inputs += [wih, whh, bias]
        in_specs += [
            pl.BlockSpec((d_l, G), lambda i: (0, 0)),
            pl.BlockSpec((G, G), lambda i: (0, 0)),
            pl.BlockSpec((1, G), lambda i: (0, 0)),
        ]
    flat_inputs += [prepped["fc_w_pad"], prepped["fc_b"]]
    in_specs += [
        pl.BlockSpec((G, O), lambda i: (0, 0)),
        pl.BlockSpec((1, O), lambda i: (0, 0)),
    ]

    kernel = functools.partial(_fused_ili_lstm_kernel, num_layers=num_layers,
                               seq_len=T, batch=B_pad, hidden_dim=H)

    out_pad = pl.pallas_call(
        kernel,
        out_shape=jax.ShapeDtypeStruct((B_pad, O), jnp.float32),
        grid_spec=pltpu.PrefetchScalarGridSpec(
            num_scalar_prefetch=0,
            grid=(1,),
            in_specs=in_specs,
            out_specs=pl.BlockSpec((B_pad, O), lambda i: (0, 0)),
            scratch_shapes=[pltpu.VMEM((T * B_pad, G), jnp.float32)],
        ),
        compiler_params=pltpu.CompilerParams(
            dimension_semantics=("arbitrary",)),
    )(*flat_inputs)
    return out_pad[:B]


# ---------------------------------------------------------------------------
# Pure-JAX reference (PyTorch LSTM semantics, original [i,f,g,o] layout).
# ---------------------------------------------------------------------------
def ili_lstm_reference(x_btd, params):
    B, T, _ = x_btd.shape
    H = params["lstm"][0]["w_hh"].shape[1]
    y = jnp.transpose(x_btd, (1, 0, 2)).astype(jnp.float32)
    for layer in params["lstm"]:
        w_ih, w_hh = layer["w_ih"], layer["w_hh"]
        b = layer["b_ih"] + layer["b_hh"]
        h = jnp.zeros((B, H), jnp.float32)
        c = jnp.zeros((B, H), jnp.float32)
        outs = []
        for t in range(T):
            gates = y[t] @ w_ih.T + h @ w_hh.T + b
            i = jax.nn.sigmoid(gates[:, 0 * H:1 * H])
            f = jax.nn.sigmoid(gates[:, 1 * H:2 * H])
            g = jnp.tanh(gates[:, 2 * H:3 * H])
            o = jax.nn.sigmoid(gates[:, 3 * H:4 * H])
            c = f * c + i * g
            h = o * jnp.tanh(c)
            outs.append(h)
        y = jnp.stack(outs, axis=0)
    return y[-1] @ params["fc_w"].T + params["fc_b"]


# ---------------------------------------------------------------------------
# Deterministic parameter init (same shapes as nn.LSTM / nn.Linear).
# ---------------------------------------------------------------------------
def init_params(key, input_dim, hidden_dim, num_layers, output_dim):
    params = {"lstm": []}
    scale = 1.0 / jnp.sqrt(hidden_dim)
    for layer in range(num_layers):
        d_in = input_dim if layer == 0 else hidden_dim
        key, k1, k2, k3, k4 = jax.random.split(key, 5)
        params["lstm"].append({
            "w_ih": jax.random.uniform(k1, (4 * hidden_dim, d_in),
                                       jnp.float32, -scale, scale),
            "w_hh": jax.random.uniform(k2, (4 * hidden_dim, hidden_dim),
                                       jnp.float32, -scale, scale),
            "b_ih": jax.random.uniform(k3, (4 * hidden_dim,),
                                       jnp.float32, -scale, scale),
            "b_hh": jax.random.uniform(k4, (4 * hidden_dim,),
                                       jnp.float32, -scale, scale),
        })
    key, k5, k6 = jax.random.split(key, 3)
    params["fc_w"] = jax.random.uniform(k5, (output_dim, hidden_dim),
                                        jnp.float32, -scale, scale)
    params["fc_b"] = jax.random.uniform(k6, (output_dim,),
                                        jnp.float32, -scale, scale)
    return params


if __name__ == "__main__":
    INPUT_DIM, HIDDEN_DIM, NUM_LAYERS, OUTPUT_DIM = 4, 32, 2, 4
    B, T = 2, 8

    key = jax.random.PRNGKey(0)
    key_x, key_p = jax.random.split(key)
    x = jax.random.normal(key_x, (B, T, INPUT_DIM), jnp.float32)
    params = init_params(key_p, INPUT_DIM, HIDDEN_DIM, NUM_LAYERS, OUTPUT_DIM)

    prepped = prepare_params(params)                  # one-time weight prep
    out = ili_lstm_forward(x, prepped)
    out = jax.block_until_ready(out)

    ref = ili_lstm_reference(x, params)
    assert out.shape == (B, OUTPUT_DIM), out.shape
    assert jnp.allclose(out, ref, atol=1e-4, rtol=1e-4), (out, ref)

    print("KERNEL_OK")
</pallas_src>

<mosaic_0001>
module attributes {stable_mosaic.version = 11 : i64} {
  func.func @_fused_ili_lstm_kernel(%arg0: i32, %arg1: memref<64x4xf32, #tpu.memory_space<vmem>>, %arg2: memref<4x128xf32, #tpu.memory_space<vmem>>, %arg3: memref<128x128xf32, #tpu.memory_space<vmem>>, %arg4: memref<1x128xf32, #tpu.memory_space<vmem>>, %arg5: memref<128x128xf32, #tpu.memory_space<vmem>>, %arg6: memref<128x128xf32, #tpu.memory_space<vmem>>, %arg7: memref<1x128xf32, #tpu.memory_space<vmem>>, %arg8: memref<128x4xf32, #tpu.memory_space<vmem>>, %arg9: memref<1x4xf32, #tpu.memory_space<vmem>>, %arg10: memref<8x4xf32, #tpu.memory_space<vmem>>, %arg11: memref<64x128xf32, #tpu.memory_space<vmem>>) attributes {dimension_semantics = [#tpu.dimension_semantics<arbitrary>], iteration_bounds = array<i64: 1>, scalar_prefetch = 0 : i64, scratch_operands = 1 : i64, tpu.core_type = #tpu.core_type<tc>, window_params = [{pipeline_mode = #tpu.pipeline_mode<synchronous>, transform_indices = @transform_0, window_bounds = array<i64: 64, 4>}, {pipeline_mode = #tpu.pipeline_mode<synchronous>, transform_indices = @transform_1, window_bounds = array<i64: 4, 128>}, {pipeline_mode = #tpu.pipeline_mode<synchronous>, transform_indices = @transform_2, window_bounds = array<i64: 128, 128>}, {pipeline_mode = #tpu.pipeline_mode<synchronous>, transform_indices = @transform_3, window_bounds = array<i64: 1, 128>}, {pipeline_mode = #tpu.pipeline_mode<synchronous>, transform_indices = @transform_4, window_bounds = array<i64: 128, 128>}, {pipeline_mode = #tpu.pipeline_mode<synchronous>, transform_indices = @transform_5, window_bounds = array<i64: 128, 128>}, {pipeline_mode = #tpu.pipeline_mode<synchronous>, transform_indices = @transform_6, window_bounds = array<i64: 1, 128>}, {pipeline_mode = #tpu.pipeline_mode<synchronous>, transform_indices = @transform_7, window_bounds = array<i64: 128, 4>}, {pipeline_mode = #tpu.pipeline_mode<synchronous>, transform_indices = @transform_8, window_bounds = array<i64: 1, 4>}, {pipeline_mode = #tpu.pipeline_mode<synchronous>, transform_indices = @transform_9, window_bounds = array<i64: 8, 4>}]} {
    %0 = tpu.iota {dimensions = array<i32: 1>} : vector<8x128xi32>
    %c96_i32 = arith.constant 96 : i32
    %1 = vector.broadcast %c96_i32 : i32 to vector<8x128xi32>
    %2 = arith.cmpi slt, %0, %1 : vector<8x128xi32>
    %c0 = arith.constant 0 : index
    %c0_0 = arith.constant 0 : index
    %3 = vector.load %arg2[%c0, %c0_0] : memref<4x128xf32, #tpu.memory_space<vmem>>, vector<4x128xf32>
    %c0_1 = arith.constant 0 : index
    %c0_2 = arith.constant 0 : index
    %4 = vector.load %arg3[%c0_1, %c0_2] : memref<128x128xf32, #tpu.memory_space<vmem>>, vector<128x128xf32>
    %c0_3 = arith.constant 0 : index
    %c0_4 = arith.constant 0 : index
    %5 = vector.load %arg4[%c0_3, %c0_4] : memref<1x128xf32, #tpu.memory_space<vmem>>, vector<1x128xf32>
    %c0_5 = arith.constant 0 : index
    %c0_6 = arith.constant 0 : index
    %6 = vector.load %arg1[%c0_5, %c0_6] : memref<64x4xf32, #tpu.memory_space<vmem>>, vector<64x4xf32>
    %cst = arith.constant dense<0.000000e+00> : vector<64x128xf32>
    %7 = tpu.matmul %6, %3, %cst {dimension_numbers = #tpu.dot_dimension_numbers<[1], [0], [0], [1], [0, 0, 1, 1], [], []>} : vector<64x4xf32>, vector<4x128xf32>, vector<64x128xf32> -> vector<64x128xf32>
    %8 = vector.broadcast %5 : vector<1x128xf32> to vector<64x128xf32>
    %9 = arith.addf %7, %8 : vector<64x128xf32>
    %cst_7 = arith.constant 0.000000e+00 : f32
    %10 = vector.broadcast %cst_7 : f32 to vector<8x128xf32>
    %cst_8 = arith.constant 0.000000e+00 : f32
    %11 = vector.broadcast %cst_8 : f32 to vector<8x128xf32>
    %12 = vector.extract_strided_slice %9 {offsets = [0, 0], sizes = [8, 128], strides = [1, 1]} : vector<64x128xf32> to vector<8x128xf32>
    %cst_9 = arith.constant dense<0.000000e+00> : vector<8x128xf32>
    %13 = tpu.matmul %11, %4, %cst_9 {dimension_numbers = #tpu.dot_dimension_numbers<[1], [0], [0], [1], [0, 0, 1, 1], [], []>} : vector<8x128xf32>, vector<128x128xf32>, vector<8x128xf32> -> vector<8x128xf32>
    %14 = arith.addf %12, %13 : vector<8x128xf32>
    %15 = arith.negf %14 : vector<8x128xf32>
    %16 = math.exp %15 : vector<8x128xf32>
    %cst_10 = arith.constant 1.000000e+00 : f32
    %17 = vector.broadcast %cst_10 : f32 to vector<8x128xf32>
    %18 = arith.addf %17, %16 : vector<8x128xf32>
    %19 = arith.divf %17, %18 : vector<8x128xf32>
    %20 = math.tanh %14 : vector<8x128xf32>
    %21 = arith.select %2, %19, %20 : vector<8x128xi1>, vector<8x128xf32>
    %c96_i32_11 = arith.constant 96 : i32
    %22 = tpu.dynamic_rotate %21 by %c96_i32_11 dim 1 : vector<8x128xf32>, i32 -> vector<8x128xf32>
    %c64_i32 = arith.constant 64 : i32
    %23 = tpu.dynamic_rotate %21 by %c64_i32 dim 1 : vector<8x128xf32>, i32 -> vector<8x128xf32>
    %c32_i32 = arith.constant 32 : i32
    %24 = tpu.dynamic_rotate %21 by %c32_i32 dim 1 : vector<8x128xf32>, i32 -> vector<8x128xf32>
    %25 = arith.mulf %22, %10 : vector<8x128xf32>
    %26 = arith.mulf %21, %24 : vector<8x128xf32>
    %27 = arith.addf %25, %26 : vector<8x128xf32>
    %28 = math.tanh %27 : vector<8x128xf32>
    %29 = arith.mulf %23, %28 : vector<8x128xf32>
    %c0_12 = arith.constant 0 : index
    %c0_13 = arith.constant 0 : index
    %30 = vector.load %arg11[%c0_12, %c0_13] : memref<64x128xf32, #tpu.memory_space<vmem>>, vector<8x128xf32>
    tpu.vector_store %arg11[%c0_12, %c0_13], %29 {strides = array<i32>} : memref<64x128xf32, #tpu.memory_space<vmem>>, vector<8x128xf32>,
    %31 = vector.extract_strided_slice %9 {offsets = [8, 0], sizes = [8, 128], strides = [1, 1]} : vector<64x128xf32> to vector<8x128xf32>
    %cst_14 = arith.constant dense<0.000000e+00> : vector<8x128xf32>
    %32 = tpu.matmul %29, %4, %cst_14 {dimension_numbers = #tpu.dot_dimension_numbers<[1], [0], [0], [1], [0, 0, 1, 1], [], []>} : vector<8x128xf32>, vector<128x128xf32>, vector<8x128xf32> -> vector<8x128xf32>
    %33 = arith.addf %31, %32 : vector<8x128xf32>
    %34 = arith.negf %33 : vector<8x128xf32>
    %35 = math.exp %34 : vector<8x128xf32>
    %cst_15 = arith.constant 1.000000e+00 : f32
    %36 = vector.broadcast %cst_15 : f32 to vector<8x128xf32>
    %37 = arith.addf %36, %35 : vector<8x128xf32>
    %38 = arith.divf %36, %37 : vector<8x128xf32>
    %39 = math.tanh %33 : vector<8x128xf32>
    %40 = arith.select %2, %38, %39 : vector<8x128xi1>, vector<8x128xf32>
    %c96_i32_16 = arith.constant 96 : i32
    %41 = tpu.dynamic_rotate %40 by %c96_i32_16 dim 1 : vector<8x128xf32>, i32 -> vector<8x128xf32>
    %c64_i32_17 = arith.constant 64 : i32
    %42 = tpu.dynamic_rotate %40 by %c64_i32_17 dim 1 : vector<8x128xf32>, i32 -> vector<8x128xf32>
    %c32_i32_18 = arith.constant 32 : i32
    %43 = tpu.dynamic_rotate %40 by %c32_i32_18 dim 1 : vector<8x128xf32>, i32 -> vector<8x128xf32>
    %44 = arith.mulf %41, %27 : vector<8x128xf32>
    %45 = arith.mulf %40, %43 : vector<8x128xf32>
    %46 = arith.addf %44, %45 : vector<8x128xf32>
    %47 = math.tanh %46 : vector<8x128xf32>
    %48 = arith.mulf %42, %47 : vector<8x128xf32>
    %c8 = arith.constant 8 : index
    %c0_19 = arith.constant 0 : index
    %49 = vector.load %arg11[%c8, %c0_19] : memref<64x128xf32, #tpu.memory_space<vmem>>, vector<8x128xf32>
    tpu.vector_store %arg11[%c8, %c0_19], %48 {strides = array<i32>} : memref<64x128xf32, #tpu.memory_space<vmem>>, vector<8x128xf32>,
    %50 = vector.extract_strided_slice %9 {offsets = [16, 0], sizes = [8, 128], strides = [1, 1]} : vector<64x128xf32> to vector<8x128xf32>
    %cst_20 = arith.constant dense<0.000000e+00> : vector<8x128xf32>
    %51 = tpu.matmul %48, %4, %cst_20 {dimension_numbers = #tpu.dot_dimension_numbers<[1], [0], [0], [1], [0, 0, 1, 1], [], []>} : vector<8x128xf32>, vector<128x128xf32>, vector<8x128xf32> -> vector<8x128xf32>
    %52 = arith.addf %50, %51 : vector<8x128xf32>
    %53 = arith.negf %52 : vector<8x128xf32>
    %54 = math.exp %53 : vector<8x128xf32>
    %cst_21 = arith.constant 1.000000e+00 : f32
    %55 = vector.broadcast %cst_21 : f32 to vector<8x128xf32>
    %56 = arith.addf %55, %54 : vector<8x128xf32>
    %57 = arith.divf %55, %56 : vector<8x128xf32>
    %58 = math.tanh %52 : vector<8x128xf32>
    %59 = arith.select %2, %57, %58 : vector<8x128xi1>, vector<8x128xf32>
    %c96_i32_22 = arith.constant 96 : i32
    %60 = tpu.dynamic_rotate %59 by %c96_i32_22 dim 1 : vector<8x128xf32>, i32 -> vector<8x128xf32>
    %c64_i32_23 = arith.constant 64 : i32
    %61 = tpu.dynamic_rotate %59 by %c64_i32_23 dim 1 : vector<8x128xf32>, i32 -> vector<8x128xf32>
    %c32_i32_24 = arith.constant 32 : i32
    %62 = tpu.dynamic_rotate %59 by %c32_i32_24 dim 1 : vector<8x128xf32>, i32 -> vector<8x128xf32>
    %63 = arith.mulf %60, %46 : vector<8x128xf32>
    %64 = arith.mulf %59, %62 : vector<8x128xf32>
    %65 = arith.addf %63, %64 : vector<8x128xf32>
    %66 = math.tanh %65 : vector<8x128xf32>
    %67 = arith.mulf %61, %66 : vector<8x128xf32>
    %c16 = arith.constant 16 : index
    %c0_25 = arith.constant 0 : index
    %68 = vector.load %arg11[%c16, %c0_25] : memref<64x128xf32, #tpu.memory_space<vmem>>, vector<8x128xf32>
    tpu.vector_store %arg11[%c16, %c0_25], %67 {strides = array<i32>} : memref<64x128xf32, #tpu.memory_space<vmem>>, vector<8x128xf32>,
    %69 = vector.extract_strided_slice %9 {offsets = [24, 0], sizes = [8, 128], strides = [1, 1]} : vector<64x128xf32> to vector<8x128xf32>
    %cst_26 = arith.constant dense<0.000000e+00> : vector<8x128xf32>
    %70 = tpu.matmul %67, %4, %cst_26 {dimension_numbers = #tpu.dot_dimension_numbers<[1], [0], [0], [1], [0, 0, 1, 1], [], []>} : vector<8x128xf32>, vector<128x128xf32>, vector<8x128xf32> -> vector<8x128xf32>
    %71 = arith.addf %69, %70 : vector<8x128xf32>
    %72 = arith.negf %71 : vector<8x128xf32>
    %73 = math.exp %72 : vector<8x128xf32>
    %cst_27 = arith.constant 1.000000e+00 : f32
    %74 = vector.broadcast %cst_27 : f32 to vector<8x128xf32>
    %75 = arith.addf %74, %73 : vector<8x128xf32>
    %76 = arith.divf %74, %75 : vector<8x128xf32>
    %77 = math.tanh %71 : vector<8x128xf32>
    %78 = arith.select %2, %76, %77 : vector<8x128xi1>, vector<8x128xf32>
    %c96_i32_28 = arith.constant 96 : i32
    %79 = tpu.dynamic_rotate %78 by %c96_i32_28 dim 1 : vector<8x128xf32>, i32 -> vector<8x128xf32>
    %c64_i32_29 = arith.constant 64 : i32
    %80 = tpu.dynamic_rotate %78 by %c64_i32_29 dim 1 : vector<8x128xf32>, i32 -> vector<8x128xf32>
    %c32_i32_30 = arith.constant 32 : i32
    %81 = tpu.dynamic_rotate %78 by %c32_i32_30 dim 1 : vector<8x128xf32>, i32 -> vector<8x128xf32>
    %82 = arith.mulf %79, %65 : vector<8x128xf32>
    %83 = arith.mulf %78, %81 : vector<8x128xf32>
    %84 = arith.addf %82, %83 : vector<8x128xf32>
    %85 = math.tanh %84 : vector<8x128xf32>
    %86 = arith.mulf %80, %85 : vector<8x128xf32>
    %c24 = arith.constant 24 : index
    %c0_31 = arith.constant 0 : index
    %87 = vector.load %arg11[%c24, %c0_31] : memref<64x128xf32, #tpu.memory_space<vmem>>, vector<8x128xf32>
    tpu.vector_store %arg11[%c24, %c0_31], %86 {strides = array<i32>} : memref<64x128xf32, #tpu.memory_space<vmem>>, vector<8x128xf32>,
    %88 = vector.extract_strided_slice %9 {offsets = [32, 0], sizes = [8, 128], strides = [1, 1]} : vector<64x128xf32> to vector<8x128xf32>
    %cst_32 = arith.constant dense<0.000000e+00> : vector<8x128xf32>
    %89 = tpu.matmul %86, %4, %cst_32 {dimension_numbers = #tpu.dot_dimension_numbers<[1], [0], [0], [1], [0, 0, 1, 1], [], []>} : vector<8x128xf32>, vector<128x128xf32>, vector<8x128xf32> -> vector<8x128xf32>
    %90 = arith.addf %88, %89 : vector<8x128xf32>
    %91 = arith.negf %90 : vector<8x128xf32>
    %92 = math.exp %91 : vector<8x128xf32>
    %cst_33 = arith.constant 1.000000e+00 : f32
    %93 = vector.broadcast %cst_33 : f32 to vector<8x128xf32>
    %94 = arith.addf %93, %92 : vector<8x128xf32>
    %95 = arith.divf %93, %94 : vector<8x128xf32>
    %96 = math.tanh %90 : vector<8x128xf32>
    %97 = arith.select %2, %95, %96 : vector<8x128xi1>, vector<8x128xf32>
    %c96_i32_34 = arith.constant 96 : i32
    %98 = tpu.dynamic_rotate %97 by %c96_i32_34 dim 1 : vector<8x128xf32>, i32 -> vector<8x128xf32>
    %c64_i32_35 = arith.constant 64 : i32
    %99 = tpu.dynamic_rotate %97 by %c64_i32_35 dim 1 : vector<8x128xf32>, i32 -> vector<8x128xf32>
    %c32_i32_36 = arith.constant 32 : i32
    %100 = tpu.dynamic_rotate %97 by %c32_i32_36 dim 1 : vector<8x128xf32>, i32 -> vector<8x128xf32>
    %101 = arith.mulf %98, %84 : vector<8x128xf32>
    %102 = arith.mulf %97, %100 : vector<8x128xf32>
    %103 = arith.addf %101, %102 : vector<8x128xf32>
    %104 = math.tanh %103 : vector<8x128xf32>
    %105 = arith.mulf %99, %104 : vector<8x128xf32>
    %c32 = arith.constant 32 : index
    %c0_37 = arith.constant 0 : index
    %106 = vector.load %arg11[%c32, %c0_37] : memref<64x128xf32, #tpu.memory_space<vmem>>, vector<8x128xf32>
    tpu.vector_store %arg11[%c32, %c0_37], %105 {strides = array<i32>} : memref<64x128xf32, #tpu.memory_space<vmem>>, vector<8x128xf32>,
    %107 = vector.extract_strided_slice %9 {offsets = [40, 0], sizes = [8, 128], strides = [1, 1]} : vector<64x128xf32> to vector<8x128xf32>
    %cst_38 = arith.constant dense<0.000000e+00> : vector<8x128xf32>
    %108 = tpu.matmul %105, %4, %cst_38 {dimension_numbers = #tpu.dot_dimension_numbers<[1], [0], [0], [1], [0, 0, 1, 1], [], []>} : vector<8x128xf32>, vector<128x128xf32>, vector<8x128xf32> -> vector<8x128xf32>
    %109 = arith.addf %107, %108 : vector<8x128xf32>
    %110 = arith.negf %109 : vector<8x128xf32>
    %111 = math.exp %110 : vector<8x128xf32>
    %cst_39 = arith.constant 1.000000e+00 : f32
    %112 = vector.broadcast %cst_39 : f32 to vector<8x128xf32>
    %113 = arith.addf %112, %111 : vector<8x128xf32>
    %114 = arith.divf %112, %113 : vector<8x128xf32>
    %115 = math.tanh %109 : vector<8x128xf32>
    %116 = arith.select %2, %114, %115 : vector<8x128xi1>, vector<8x128xf32>
    %c96_i32_40 = arith.constant 96 : i32
    %117 = tpu.dynamic_rotate %116 by %c96_i32_40 dim 1 : vector<8x128xf32>, i32 -> vector<8x128xf32>
    %c64_i32_41 = arith.constant 64 : i32
    %118 = tpu.dynamic_rotate %116 by %c64_i32_41 dim 1 : vector<8x128xf32>, i32 -> vector<8x128xf32>
    %c32_i32_42 = arith.constant 32 : i32
    %119 = tpu.dynamic_rotate %116 by %c32_i32_42 dim 1 : vector<8x128xf32>, i32 -> vector<8x128xf32>
    %120 = arith.mulf %117, %103 : vector<8x128xf32>
    %121 = arith.mulf %116, %119 : vector<8x128xf32>
    %122 = arith.addf %120, %121 : vector<8x128xf32>
    %123 = math.tanh %122 : vector<8x128xf32>
    %124 = arith.mulf %118, %123 : vector<8x128xf32>
    %c40 = arith.constant 40 : index
    %c0_43 = arith.constant 0 : index
    %125 = vector.load %arg11[%c40, %c0_43] : memref<64x128xf32, #tpu.memory_space<vmem>>, vector<8x128xf32>
    tpu.vector_store %arg11[%c40, %c0_43], %124 {strides = array<i32>} : memref<64x128xf32, #tpu.memory_space<vmem>>, vector<8x128xf32>,
    %126 = vector.extract_strided_slice %9 {offsets = [48, 0], sizes = [8, 128], strides = [1, 1]} : vector<64x128xf32> to vector<8x128xf32>
    %cst_44 = arith.constant dense<0.000000e+00> : vector<8x128xf32>
    %127 = tpu.matmul %124, %4, %cst_44 {dimension_numbers = #tpu.dot_dimension_numbers<[1], [0], [0], [1], [0, 0, 1, 1], [], []>} : vector<8x128xf32>, vector<128x128xf32>, vector<8x128xf32> -> vector<8x128xf32>
    %128 = arith.addf %126, %127 : vector<8x128xf32>
    %129 = arith.negf %128 : vector<8x128xf32>
    %130 = math.exp %129 : vector<8x128xf32>
    %cst_45 = arith.constant 1.000000e+00 : f32
    %131 = vector.broadcast %cst_45 : f32 to vector<8x128xf32>
    %132 = arith.addf %131, %130 : vector<8x128xf32>
    %133 = arith.divf %131, %132 : vector<8x128xf32>
    %134 = math.tanh %128 : vector<8x128xf32>
    %135 = arith.select %2, %133, %134 : vector<8x128xi1>, vector<8x128xf32>
    %c96_i32_46 = arith.constant 96 : i32
    %136 = tpu.dynamic_rotate %135 by %c96_i32_46 dim 1 : vector<8x128xf32>, i32 -> vector<8x128xf32>
    %c64_i32_47 = arith.constant 64 : i32
    %137 = tpu.dynamic_rotate %135 by %c64_i32_47 dim 1 : vector<8x128xf32>, i32 -> vector<8x128xf32>
    %c32_i32_48 = arith.constant 32 : i32
    %138 = tpu.dynamic_rotate %135 by %c32_i32_48 dim 1 : vector<8x128xf32>, i32 -> vector<8x128xf32>
    %139 = arith.mulf %136, %122 : vector<8x128xf32>
    %140 = arith.mulf %135, %138 : vector<8x128xf32>
    %141 = arith.addf %139, %140 : vector<8x128xf32>
    %142 = math.tanh %141 : vector<8x128xf32>
    %143 = arith.mulf %137, %142 : vector<8x128xf32>
    %c48 = arith.constant 48 : index
    %c0_49 = arith.constant 0 : index
    %144 = vector.load %arg11[%c48, %c0_49] : memref<64x128xf32, #tpu.memory_space<vmem>>, vector<8x128xf32>
    tpu.vector_store %arg11[%c48, %c0_49], %143 {strides = array<i32>} : memref<64x128xf32, #tpu.memory_space<vmem>>, vector<8x128xf32>,
    %145 = vector.extract_strided_slice %9 {offsets = [56, 0], sizes = [8, 128], strides = [1, 1]} : vector<64x128xf32> to vector<8x128xf32>
    %cst_50 = arith.constant dense<0.000000e+00> : vector<8x128xf32>
    %146 = tpu.matmul %143, %4, %cst_50 {dimension_numbers = #tpu.dot_dimension_numbers<[1], [0], [0], [1], [0, 0, 1, 1], [], []>} : vector<8x128xf32>, vector<128x128xf32>, vector<8x128xf32> -> vector<8x128xf32>
    %147 = arith.addf %145, %146 : vector<8x128xf32>
    %148 = arith.negf %147 : vector<8x128xf32>
    %149 = math.exp %148 : vector<8x128xf32>
    %cst_51 = arith.constant 1.000000e+00 : f32
    %150 = vector.broadcast %cst_51 : f32 to vector<8x128xf32>
    %151 = arith.addf %150, %149 : vector<8x128xf32>
    %152 = arith.divf %150, %151 : vector<8x128xf32>
    %153 = math.tanh %147 : vector<8x128xf32>
    %154 = arith.select %2, %152, %153 : vector<8x128xi1>, vector<8x128xf32>
    %c96_i32_52 = arith.constant 96 : i32
    %155 = tpu.dynamic_rotate %154 by %c96_i32_52 dim 1 : vector<8x128xf32>, i32 -> vector<8x128xf32>
    %c64_i32_53 = arith.constant 64 : i32
    %156 = tpu.dynamic_rotate %154 by %c64_i32_53 dim 1 : vector<8x128xf32>, i32 -> vector<8x128xf32>
    %c32_i32_54 = arith.constant 32 : i32
    %157 = tpu.dynamic_rotate %154 by %c32_i32_54 dim 1 : vector<8x128xf32>, i32 -> vector<8x128xf32>
    %158 = arith.mulf %155, %141 : vector<8x128xf32>
    %159 = arith.mulf %154, %157 : vector<8x128xf32>
    %160 = arith.addf %158, %159 : vector<8x128xf32>
    %161 = math.tanh %160 : vector<8x128xf32>
    %162 = arith.mulf %156, %161 : vector<8x128xf32>
    %c56 = arith.constant 56 : index
    %c0_55 = arith.constant 0 : index
    %163 = vector.load %arg11[%c56, %c0_55] : memref<64x128xf32, #tpu.memory_space<vmem>>, vector<8x128xf32>
    tpu.vector_store %arg11[%c56, %c0_55], %162 {strides = array<i32>} : memref<64x128xf32, #tpu.memory_space<vmem>>, vector<8x128xf32>,
    %c0_56 = arith.constant 0 : index
    %c0_57 = arith.constant 0 : index
    %164 = vector.load %arg5[%c0_56, %c0_57] : memref<128x128xf32, #tpu.memory_space<vmem>>, vector<128x128xf32>
    %c0_58 = arith.constant 0 : index
    %c0_59 = arith.constant 0 : index
    %165 = vector.load %arg6[%c0_58, %c0_59] : memref<128x128xf32, #tpu.memory_space<vmem>>, vector<128x128xf32>
    %c0_60 = arith.constant 0 : index
    %c0_61 = arith.constant 0 : index
    %166 = vector.load %arg7[%c0_60, %c0_61] : memref<1x128xf32, #tpu.memory_space<vmem>>, vector<1x128xf32>
    %c0_62 = arith.constant 0 : index
    %c0_63 = arith.constant 0 : index
    %167 = vector.load %arg11[%c0_62, %c0_63] : memref<64x128xf32, #tpu.memory_space<vmem>>, vector<64x128xf32>
    %cst_64 = arith.constant dense<0.000000e+00> : vector<64x128xf32>
    %168 = tpu.matmul %167, %164, %cst_64 {dimension_numbers = #tpu.dot_dimension_numbers<[1], [0], [0], [1], [0, 0, 1, 1], [], []>} : vector<64x128xf32>, vector<128x128xf32>, vector<64x128xf32> -> vector<64x128xf32>
    %169 = vector.broadcast %166 : vector<1x128xf32> to vector<64x128xf32>
    %170 = arith.addf %168, %169 : vector<64x128xf32>
    %cst_65 = arith.constant 0.000000e+00 : f32
    %171 = vector.broadcast %cst_65 : f32 to vector<8x128xf32>
    %cst_66 = arith.constant 0.000000e+00 : f32
    %172 = vector.broadcast %cst_66 : f32 to vector<8x128xf32>
    %173 = vector.extract_strided_slice %170 {offsets = [0, 0], sizes = [8, 128], strides = [1, 1]} : vector<64x128xf32> to vector<8x128xf32>
    %cst_67 = arith.constant dense<0.000000e+00> : vector<8x128xf32>
    %174 = tpu.matmul %172, %165, %cst_67 {dimension_numbers = #tpu.dot_dimension_numbers<[1], [0], [0], [1], [0, 0, 1, 1], [], []>} : vector<8x128xf32>, vector<128x128xf32>, vector<8x128xf32> -> vector<8x128xf32>
    %175 = arith.addf %173, %174 : vector<8x128xf32>
    %176 = arith.negf %175 : vector<8x128xf32>
    %177 = math.exp %176 : vector<8x128xf32>
    %cst_68 = arith.constant 1.000000e+00 : f32
    %178 = vector.broadcast %cst_68 : f32 to vector<8x128xf32>
    %179 = arith.addf %178, %177 : vector<8x128xf32>
    %180 = arith.divf %178, %179 : vector<8x128xf32>
    %181 = math.tanh %175 : vector<8x128xf32>
    %182 = arith.select %2, %180, %181 : vector<8x128xi1>, vector<8x128xf32>
    %c96_i32_69 = arith.constant 96 : i32
    %183 = tpu.dynamic_rotate %182 by %c96_i32_69 dim 1 : vector<8x128xf32>, i32 -> vector<8x128xf32>
    %c64_i32_70 = arith.constant 64 : i32
    %184 = tpu.dynamic_rotate %182 by %c64_i32_70 dim 1 : vector<8x128xf32>, i32 -> vector<8x128xf32>
    %c32_i32_71 = arith.constant 32 : i32
    %185 = tpu.dynamic_rotate %182 by %c32_i32_71 dim 1 : vector<8x128xf32>, i32 -> vector<8x128xf32>
    %186 = arith.mulf %183, %171 : vector<8x128xf32>
    %187 = arith.mulf %182, %185 : vector<8x128xf32>
    %188 = arith.addf %186, %187 : vector<8x128xf32>
    %189 = math.tanh %188 : vector<8x128xf32>
    %190 = arith.mulf %184, %189 : vector<8x128xf32>
    %191 = vector.extract_strided_slice %170 {offsets = [8, 0], sizes = [8, 128], strides = [1, 1]} : vector<64x128xf32> to vector<8x128xf32>
    %cst_72 = arith.constant dense<0.000000e+00> : vector<8x128xf32>
    %192 = tpu.matmul %190, %165, %cst_72 {dimension_numbers = #tpu.dot_dimension_numbers<[1], [0], [0], [1], [0, 0, 1, 1], [], []>} : vector<8x128xf32>, vector<128x128xf32>, vector<8x128xf32> -> vector<8x128xf32>
    %193 = arith.addf %191, %192 : vector<8x128xf32>
    %194 = arith.negf %193 : vector<8x128xf32>
    %195 = math.exp %194 : vector<8x128xf32>
    %cst_73 = arith.constant 1.000000e+00 : f32
    %196 = vector.broadcast %cst_73 : f32 to vector<8x128xf32>
    %197 = arith.addf %196, %195 : vector<8x128xf32>
    %198 = arith.divf %196, %197 : vector<8x128xf32>
    %199 = math.tanh %193 : vector<8x128xf32>
    %200 = arith.select %2, %198, %199 : vector<8x128xi1>, vector<8x128xf32>
    %c96_i32_74 = arith.constant 96 : i32
    %201 = tpu.dynamic_rotate %200 by %c96_i32_74 dim 1 : vector<8x128xf32>, i32 -> vector<8x128xf32>
    %c64_i32_75 = arith.constant 64 : i32
    %202 = tpu.dynamic_rotate %200 by %c64_i32_75 dim 1 : vector<8x128xf32>, i32 -> vector<8x128xf32>
    %c32_i32_76 = arith.constant 32 : i32
    %203 = tpu.dynamic_rotate %200 by %c32_i32_76 dim 1 : vector<8x128xf32>, i32 -> vector<8x128xf32>
    %204 = arith.mulf %201, %188 : vector<8x128xf32>
    %205 = arith.mulf %200, %203 : vector<8x128xf32>
    %206 = arith.addf %204, %205 : vector<8x128xf32>
    %207 = math.tanh %206 : vector<8x128xf32>
    %208 = arith.mulf %202, %207 : vector<8x128xf32>
    %209 = vector.extract_strided_slice %170 {offsets = [16, 0], sizes = [8, 128], strides = [1, 1]} : vector<64x128xf32> to vector<8x128xf32>
    %cst_77 = arith.constant dense<0.000000e+00> : vector<8x128xf32>
    %210 = tpu.matmul %208, %165, %cst_77 {dimension_numbers = #tpu.dot_dimension_numbers<[1], [0], [0], [1], [0, 0, 1, 1], [], []>} : vector<8x128xf32>, vector<128x128xf32>, vector<8x128xf32> -> vector<8x128xf32>
    %211 = arith.addf %209, %210 : vector<8x128xf32>
    %212 = arith.negf %211 : vector<8x128xf32>
    %213 = math.exp %212 : vector<8x128xf32>
    %cst_78 = arith.constant 1.000000e+00 : f32
    %214 = vector.broadcast %cst_78 : f32 to vector<8x128xf32>
    %215 = arith.addf %214, %213 : vector<8x128xf32>
    %216 = arith.divf %214, %215 : vector<8x128xf32>
    %217 = math.tanh %211 : vector<8x128xf32>
    %218 = arith.select %2, %216, %217 : vector<8x128xi1>, vector<8x128xf32>
    %c96_i32_79 = arith.constant 96 : i32
    %219 = tpu.dynamic_rotate %218 by %c96_i32_79 dim 1 : vector<8x128xf32>, i32 -> vector<8x128xf32>
    %c64_i32_80 = arith.constant 64 : i32
    %220 = tpu.dynamic_rotate %218 by %c64_i32_80 dim 1 : vector<8x128xf32>, i32 -> vector<8x128xf32>
    %c32_i32_81 = arith.constant 32 : i32
    %221 = tpu.dynamic_rotate %218 by %c32_i32_81 dim 1 : vector<8x128xf32>, i32 -> vector<8x128xf32>
    %222 = arith.mulf %219, %206 : vector<8x128xf32>
    %223 = arith.mulf %218, %221 : vector<8x128xf32>
    %224 = arith.addf %222, %223 : vector<8x128xf32>
    %225 = math.tanh %224 : vector<8x128xf32>
    %226 = arith.mulf %220, %225 : vector<8x128xf32>
    %227 = vector.extract_strided_slice %170 {offsets = [24, 0], sizes = [8, 128], strides = [1, 1]} : vector<64x128xf32> to vector<8x128xf32>
    %cst_82 = arith.constant dense<0.000000e+00> : vector<8x128xf32>
    %228 = tpu.matmul %226, %165, %cst_82 {dimension_numbers = #tpu.dot_dimension_numbers<[1], [0], [0], [1], [0, 0, 1, 1], [], []>} : vector<8x128xf32>, vector<128x128xf32>, vector<8x128xf32> -> vector<8x128xf32>
    %229 = arith.addf %227, %228 : vector<8x128xf32>
    %230 = arith.negf %229 : vector<8x128xf32>
    %231 = math.exp %230 : vector<8x128xf32>
    %cst_83 = arith.constant 1.000000e+00 : f32
    %232 = vector.broadcast %cst_83 : f32 to vector<8x128xf32>
    %233 = arith.addf %232, %231 : vector<8x128xf32>
    %234 = arith.divf %232, %233 : vector<8x128xf32>
    %235 = math.tanh %229 : vector<8x128xf32>
    %236 = arith.select %2, %234, %235 : vector<8x128xi1>, vector<8x128xf32>
    %c96_i32_84 = arith.constant 96 : i32
    %237 = tpu.dynamic_rotate %236 by %c96_i32_84 dim 1 : vector<8x128xf32>, i32 -> vector<8x128xf32>
    %c64_i32_85 = arith.constant 64 : i32
    %238 = tpu.dynamic_rotate %236 by %c64_i32_85 dim 1 : vector<8x128xf32>, i32 -> vector<8x128xf32>
    %c32_i32_86 = arith.constant 32 : i32
    %239 = tpu.dynamic_rotate %236 by %c32_i32_86 dim 1 : vector<8x128xf32>, i32 -> vector<8x128xf32>
    %240 = arith.mulf %237, %224 : vector<8x128xf32>
    %241 = arith.mulf %236, %239 : vector<8x128xf32>
    %242 = arith.addf %240, %241 : vector<8x128xf32>
    %243 = math.tanh %242 : vector<8x128xf32>
    %244 = arith.mulf %238, %243 : vector<8x128xf32>
    %245 = vector.extract_strided_slice %170 {offsets = [32, 0], sizes = [8, 128], strides = [1, 1]} : vector<64x128xf32> to vector<8x128xf32>
    %cst_87 = arith.constant dense<0.000000e+00> : vector<8x128xf32>
    %246 = tpu.matmul %244, %165, %cst_87 {dimension_numbers = #tpu.dot_dimension_numbers<[1], [0], [0], [1], [0, 0, 1, 1], [], []>} : vector<8x128xf32>, vector<128x128xf32>, vector<8x128xf32> -> vector<8x128xf32>
    %247 = arith.addf %245, %246 : vector<8x128xf32>
    %248 = arith.negf %247 : vector<8x128xf32>
    %249 = math.exp %248 : vector<8x128xf32>
    %cst_88 = arith.constant 1.000000e+00 : f32
    %250 = vector.broadcast %cst_88 : f32 to vector<8x128xf32>
    %251 = arith.addf %250, %249 : vector<8x128xf32>
    %252 = arith.divf %250, %251 : vector<8x128xf32>
    %253 = math.tanh %247 : vector<8x128xf32>
    %254 = arith.select %2, %252, %253 : vector<8x128xi1>, vector<8x128xf32>
    %c96_i32_89 = arith.constant 96 : i32
    %255 = tpu.dynamic_rotate %254 by %c96_i32_89 dim 1 : vector<8x128xf32>, i32 -> vector<8x128xf32>
    %c64_i32_90 = arith.constant 64 : i32
    %256 = tpu.dynamic_rotate %254 by %c64_i32_90 dim 1 : vector<8x128xf32>, i32 -> vector<8x128xf32>
    %c32_i32_91 = arith.constant 32 : i32
    %257 = tpu.dynamic_rotate %254 by %c32_i32_91 dim 1 : vector<8x128xf32>, i32 -> vector<8x128xf32>
    %258 = arith.mulf %255, %242 : vector<8x128xf32>
    %259 = arith.mulf %254, %257 : vector<8x128xf32>
    %260 = arith.addf %258, %259 : vector<8x128xf32>
    %261 = math.tanh %260 : vector<8x128xf32>
    %262 = arith.mulf %256, %261 : vector<8x128xf32>
    %263 = vector.extract_strided_slice %170 {offsets = [40, 0], sizes = [8, 128], strides = [1, 1]} : vector<64x128xf32> to vector<8x128xf32>
    %cst_92 = arith.constant dense<0.000000e+00> : vector<8x128xf32>
    %264 = tpu.matmul %262, %165, %cst_92 {dimension_numbers = #tpu.dot_dimension_numbers<[1], [0], [0], [1], [0, 0, 1, 1], [], []>} : vector<8x128xf32>, vector<128x128xf32>, vector<8x128xf32> -> vector<8x128xf32>
    %265 = arith.addf %263, %264 : vector<8x128xf32>
    %266 = arith.negf %265 : vector<8x128xf32>
    %267 = math.exp %266 : vector<8x128xf32>
    %cst_93 = arith.constant 1.000000e+00 : f32
    %268 = vector.broadcast %cst_93 : f32 to vector<8x128xf32>
    %269 = arith.addf %268, %267 : vector<8x128xf32>
    %270 = arith.divf %268, %269 : vector<8x128xf32>
    %271 = math.tanh %265 : vector<8x128xf32>
    %272 = arith.select %2, %270, %271 : vector<8x128xi1>, vector<8x128xf32>
    %c96_i32_94 = arith.constant 96 : i32
    %273 = tpu.dynamic_rotate %272 by %c96_i32_94 dim 1 : vector<8x128xf32>, i32 -> vector<8x128xf32>
    %c64_i32_95 = arith.constant 64 : i32
    %274 = tpu.dynamic_rotate %272 by %c64_i32_95 dim 1 : vector<8x128xf32>, i32 -> vector<8x128xf32>
    %c32_i32_96 = arith.constant 32 : i32
    %275 = tpu.dynamic_rotate %272 by %c32_i32_96 dim 1 : vector<8x128xf32>, i32 -> vector<8x128xf32>
    %276 = arith.mulf %273, %260 : vector<8x128xf32>
    %277 = arith.mulf %272, %275 : vector<8x128xf32>
    %278 = arith.addf %276, %277 : vector<8x128xf32>
    %279 = math.tanh %278 : vector<8x128xf32>
    %280 = arith.mulf %274, %279 : vector<8x128xf32>
    %281 = vector.extract_strided_slice %170 {offsets = [48, 0], sizes = [8, 128], strides = [1, 1]} : vector<64x128xf32> to vector<8x128xf32>
    %cst_97 = arith.constant dense<0.000000e+00> : vector<8x128xf32>
    %282 = tpu.matmul %280, %165, %cst_97 {dimension_numbers = #tpu.dot_dimension_numbers<[1], [0], [0], [1], [0, 0, 1, 1], [], []>} : vector<8x128xf32>, vector<128x128xf32>, vector<8x128xf32> -> vector<8x128xf32>
    %283 = arith.addf %281, %282 : vector<8x128xf32>
    %284 = arith.negf %283 : vector<8x128xf32>
    %285 = math.exp %284 : vector<8x128xf32>
    %cst_98 = arith.constant 1.000000e+00 : f32
    %286 = vector.broadcast %cst_98 : f32 to vector<8x128xf32>
    %287 = arith.addf %286, %285 : vector<8x128xf32>
    %288 = arith.divf %286, %287 : vector<8x128xf32>
    %289 = math.tanh %283 : vector<8x128xf32>
    %290 = arith.select %2, %288, %289 : vector<8x128xi1>, vector<8x128xf32>
    %c96_i32_99 = arith.constant 96 : i32
    %291 = tpu.dynamic_rotate %290 by %c96_i32_99 dim 1 : vector<8x128xf32>, i32 -> vector<8x128xf32>
    %c64_i32_100 = arith.constant 64 : i32
    %292 = tpu.dynamic_rotate %290 by %c64_i32_100 dim 1 : vector<8x128xf32>, i32 -> vector<8x128xf32>
    %c32_i32_101 = arith.constant 32 : i32
    %293 = tpu.dynamic_rotate %290 by %c32_i32_101 dim 1 : vector<8x128xf32>, i32 -> vector<8x128xf32>
    %294 = arith.mulf %291, %278 : vector<8x128xf32>
    %295 = arith.mulf %290, %293 : vector<8x128xf32>
    %296 = arith.addf %294, %295 : vector<8x128xf32>
    %297 = math.tanh %296 : vector<8x128xf32>
    %298 = arith.mulf %292, %297 : vector<8x128xf32>
    %299 = vector.extract_strided_slice %170 {offsets = [56, 0], sizes = [8, 128], strides = [1, 1]} : vector<64x128xf32> to vector<8x128xf32>
    %cst_102 = arith.constant dense<0.000000e+00> : vector<8x128xf32>
    %300 = tpu.matmul %298, %165, %cst_102 {dimension_numbers = #tpu.dot_dimension_numbers<[1], [0], [0], [1], [0, 0, 1, 1], [], []>} : vector<8x128xf32>, vector<128x128xf32>, vector<8x128xf32> -> vector<8x128xf32>
    %301 = arith.addf %299, %300 : vector<8x128xf32>
    %302 = arith.negf %301 : vector<8x128xf32>
    %303 = math.exp %302 : vector<8x128xf32>
    %cst_103 = arith.constant 1.000000e+00 : f32
    %304 = vector.broadcast %cst_103 : f32 to vector<8x128xf32>
    %305 = arith.addf %304, %303 : vector<8x128xf32>
    %306 = arith.divf %304, %305 : vector<8x128xf32>
    %307 = math.tanh %301 : vector<8x128xf32>
    %308 = arith.select %2, %306, %307 : vector<8x128xi1>, vector<8x128xf32>
    %c96_i32_104 = arith.constant 96 : i32
    %309 = tpu.dynamic_rotate %308 by %c96_i32_104 dim 1 : vector<8x128xf32>, i32 -> vector<8x128xf32>
    %c64_i32_105 = arith.constant 64 : i32
    %310 = tpu.dynamic_rotate %308 by %c64_i32_105 dim 1 : vector<8x128xf32>, i32 -> vector<8x128xf32>
    %c32_i32_106 = arith.constant 32 : i32
    %311 = tpu.dynamic_rotate %308 by %c32_i32_106 dim 1 : vector<8x128xf32>, i32 -> vector<8x128xf32>
    %312 = arith.mulf %309, %296 : vector<8x128xf32>
    %313 = arith.mulf %308, %311 : vector<8x128xf32>
    %314 = arith.addf %312, %313 : vector<8x128xf32>
    %315 = math.tanh %314 : vector<8x128xf32>
    %316 = arith.mulf %310, %315 : vector<8x128xf32>
    %c0_107 = arith.constant 0 : index
    %c0_108 = arith.constant 0 : index
    %317 = vector.load %arg8[%c0_107, %c0_108] : memref<128x4xf32, #tpu.memory_space<vmem>>, vector<128x4xf32>
    %cst_109 = arith.constant dense<0.000000e+00> : vector<8x4xf32>
    %318 = tpu.matmul %316, %317, %cst_109 {dimension_numbers = #tpu.dot_dimension_numbers<[1], [0], [0], [1], [0, 0, 1, 1], [], []>} : vector<8x128xf32>, vector<128x4xf32>, vector<8x4xf32> -> vector<8x4xf32>
    %c0_110 = arith.constant 0 : index
    %c0_111 = arith.constant 0 : index
    %319 = vector.load %arg9[%c0_110, %c0_111] : memref<1x4xf32, #tpu.memory_space<vmem>>, vector<1x4xf32>
    %320 = vector.broadcast %319 : vector<1x4xf32> to vector<8x4xf32>
    %321 = arith.addf %318, %320 : vector<8x4xf32>
    %c0_112 = arith.constant 0 : index
    %c0_113 = arith.constant 0 : index
    %322 = vector.load %arg10[%c0_112, %c0_113] : memref<8x4xf32, #tpu.memory_space<vmem>>, vector<8x4xf32>
    tpu.vector_store %arg10[%c0_112, %c0_113], %321 {strides = array<i32>} : memref<8x4xf32, #tpu.memory_space<vmem>>, vector<8x4xf32>,
    return
  }
  func.func @transform_0(%arg0: i32) -> (i32, i32) {
    %c0_i32 = arith.constant 0 : i32
    %c0_i32_0 = arith.constant 0 : i32
    %c0_i32_1 = arith.constant 0 : i32
    return %c0_i32, %c0_i32_0 : i32, i32
  }
  func.func @transform_1(%arg0: i32) -> (i32, i32) {
    %c0_i32 = arith.constant 0 : i32
    %c0_i32_0 = arith.constant 0 : i32
    %c0_i32_1 = arith.constant 0 : i32
    return %c0_i32, %c0_i32_0 : i32, i32
  }
  func.func @transform_2(%arg0: i32) -> (i32, i32) {
    %c0_i32 = arith.constant 0 : i32
    %c0_i32_0 = arith.constant 0 : i32
    %c0_i32_1 = arith.constant 0 : i32
    return %c0_i32, %c0_i32_0 : i32, i32
  }
  func.func @transform_3(%arg0: i32) -> (i32, i32) {
    %c0_i32 = arith.constant 0 : i32
    %c0_i32_0 = arith.constant 0 : i32
    %c0_i32_1 = arith.constant 0 : i32
    return %c0_i32, %c0_i32_0 : i32, i32
  }
  func.func @transform_4(%arg0: i32) -> (i32, i32) {
    %c0_i32 = arith.constant 0 : i32
    %c0_i32_0 = arith.constant 0 : i32
    %c0_i32_1 = arith.constant 0 : i32
    return %c0_i32, %c0_i32_0 : i32, i32
  }
  func.func @transform_5(%arg0: i32) -> (i32, i32) {
    %c0_i32 = arith.constant 0 : i32
    %c0_i32_0 = arith.constant 0 : i32
    %c0_i32_1 = arith.constant 0 : i32
    return %c0_i32, %c0_i32_0 : i32, i32
  }
  func.func @transform_6(%arg0: i32) -> (i32, i32) {
    %c0_i32 = arith.constant 0 : i32
    %c0_i32_0 = arith.constant 0 : i32
    %c0_i32_1 = arith.constant 0 : i32
    return %c0_i32, %c0_i32_0 : i32, i32
  }
  func.func @transform_7(%arg0: i32) -> (i32, i32) {
    %c0_i32 = arith.constant 0 : i32
    %c0_i32_0 = arith.constant 0 : i32
    %c0_i32_1 = arith.constant 0 : i32
    return %c0_i32, %c0_i32_0 : i32, i32
  }
  func.func @transform_8(%arg0: i32) -> (i32, i32) {
    %c0_i32 = arith.constant 0 : i32
    %c0_i32_0 = arith.constant 0 : i32
    %c0_i32_1 = arith.constant 0 : i32
    return %c0_i32, %c0_i32_0 : i32, i32
  }
  func.func @transform_9(%arg0: i32) -> (i32, i32) {
    %c0_i32 = arith.constant 0 : i32
    %c0_i32_0 = arith.constant 0 : i32
    %c0_i32_1 = arith.constant 0 : i32
    return %c0_i32, %c0_i32_0 : i32, i32
  }
}

</mosaic_0001>

<bundles_post_ra>
// kernel: tpu_custom_call.1
= control target key start
LH: loop header
LB: loop body
LE: loop exit
PB: predicated region body
PF: predicated region fallthrough
CT: control target
= control target key end

     0   :  { %14 = vsyncpa [#allocation4], 0  ;;  %s2063_s0 = inlined_call_operand.vmem [shape: f32[64,4], index: 0, kind: input, shape index: {}]   ;;  %s2064_s1 = inlined_call_operand.vmem [shape: f32[4,128], index: 1, kind: input, shape index: {}]   ;;  %s2065_s2 = inlined_call_operand.vmem [shape: f32[128,128], index: 2, kind: input, shape index: {}]   ;;  %s2066_s3 = inlined_call_operand.vmem [shape: f32[1,128], index: 3, kind: input, shape index: {}]   ;;  %s2067_s4 = inlined_call_operand.hbm [shape: f32[128,128], index: 4, kind: input, shape index: {}]   ;;  %s2068_s5 = inlined_call_operand.hbm [shape: f32[128,128], index: 5, kind: input, shape index: {}]   ;;  %s2069_s6 = inlined_call_operand.vmem [shape: f32[1,128], index: 6, kind: input, shape index: {}]   ;;  %s2070_s7 = inlined_call_operand.vmem [shape: f32[128,4], index: 7, kind: input, shape index: {}]   ;;  %s2071_s8 = inlined_call_operand.vmem [shape: f32[1,4], index: 8, kind: input, shape index: {}]   ;;  %s2072_s9 = inlined_call_operand.vmem [shape: f32[8,4], index: 9, kind: output, shape index: {}]  }
   0x1   :  { %s28_s11 = sshll.u32 %s2067_s4, 4  ;;  %s29_s11 = int_to_ptr.hbm [resolvable:$true] %s28_s11 }
   0x2   :  { %15 = vsyncpa [#allocation6], 0  ;;  %s1371_s12 = smov [#allocation3]   ;;  %s41_s16 = sshll.u32 %s2068_s5, 4  ;;  %s42_s16 = int_to_ptr.hbm [resolvable:$true] %s41_s16 }
   0x3   :  { %s30_s13 = sshll.u32 %s1371_s12, 4  ;;  %s1372_s17 = smov 128   ;;  %s31_s13 = int_to_ptr.vmem [resolvable:$true] %s30_s13 }
   0x4   :  { %s1373_s18 = smov 8   ;;  %s1374_s19 = smov [#allocation5]  }
   0x5   :  { %36 = dma.hbm_to_vmem [thread:$0]  %s29_s11, 2048, %s31_s13, [#allocation4], %s1372_s17, %s1372_s17, %s1373_s18  }
   0x6   :  { %s43_s20 = sshll.u32 %s1374_s19, 4  ;;  %s44_s20 = int_to_ptr.vmem [resolvable:$true] %s43_s20 }
   0x7   :  { %49 = dma.hbm_to_vmem [thread:$0]  %s42_s16, 2048, %s44_s20, [#allocation6], %s1372_s17, %s1372_s17, %s1373_s18  }
   0x8   :  { %1367 = dma.done.wait [#allocation4], 2048  }
   0x9   :  { %1368 = vsyncadd [#allocation4], 4294965248 }
   0xa   :  { %1369 = dma.done.wait [#allocation6], 2048  }
   0xb   :  { %1370 = vsyncadd [#allocation6], 4294965248  ;;  %v1438_v0 = vld [vmem:[%s2065_s2 + $0x78] sm:$0xff]  ;;  %v1443_v1 = vld [vmem:[%s2065_s2 + $0x70] sm:$0xff]  ;;  %vm121_vm0 = vcmask 1043456   ;;  %vm96_vm1 = vcmask 31744   ;;  %v64_v28 = vlaneseq }
   0xc   :  { %166 = vmatpush.msra.mxu1 %v1438_v0  ;;  %220 = vmatpush.msra.mxu2 %v1438_v0  ;;  %v1450_v2 = vld [vmem:[%s2065_s2 + $0x68] sm:$0xff]  ;;  %v1458_v3 = vld [vmem:[%s2065_s2 + $0x60] sm:$0xff]  ;;  %v1471_v6 = vld [vmem:[%s2065_s2 + $0x58] sm:$0xff]  ;;  %v1375_v18 = vmov 0.0   ;;  %s1376_s11 = smov 64   ;;  %s1378_s12 = smov 32  }
   0xd   :  { %274 = vmatpush.msra.mxu3 %v1438_v0  ;;  %v67_v4 = vld [vmem:[%s2064_s1] sm:$0xf]  ;;  %v1480_v7 = vld [vmem:[%s2065_s2 + $0x50] sm:$0xff]  ;;  %v1489_v8 = vld [vmem:[%s2065_s2 + $0x48] sm:$0xff]  ;;  %v1657_v31 = vand.u32 127, %v64_v28  ;;  %s1377_s1 = smov 96  }
   0xe   :  { %167 = vmatpush.msra.mxu1 %v1443_v1  ;;  %221 = vmatpush.msra.mxu2 %v1443_v1  ;;  %v85_v5 = vld [vmem:[%s2063_s0] sm:$0xff]  ;;  %v1507_v10 = vld [vmem:[%s2065_s2 + $0x38] sm:$0xff]  ;;  %v1516_v11 = vld [vmem:[%s2065_s2 + $0x30] sm:$0xff] }
   0xf   :  { %275 = vmatpush.msra.mxu3 %v1443_v1  ;;  %1154 = vmatpush.msk.msra.mxu0 %vm121_vm0, %v67_v4  ;;  %v1498_v9 = vld [vmem:[%s2065_s2 + $0x40] sm:$0xff]  ;;  %v1525_v12 = vld [vmem:[%s2065_s2 + $0x28] sm:$0xff]  ;;  %v1543_v14 = vld [vmem:[%s2065_s2 + $0x18] sm:$0xff]  ;;  %vm66_vm4 = vcmp.lt.s32.totalorder %v1657_v31, 96 }
  0x10   :  { %168 = vmatpush.msra.mxu1 %v1450_v2  ;;  %1155 = vmatmul.msk.f32.vlgmr.msra.gmra.mxu0 %vm96_vm1, %v85_v5  ;;  %v1534_v13 = vld [vmem:[%s2065_s2 + $0x20] sm:$0xff]  ;;  %v1552_v15 = vld [vmem:[%s2065_s2 + $0x10] sm:$0xff]  ;;  %v1561_v16 = vld [vmem:[%s2065_s2 + $0x8] sm:$0xff] }
  0x11   :  { %222 = vmatpush.msra.mxu2 %v1450_v2  ;;  %276 = vmatpush.msra.mxu3 %v1450_v2  ;;  %v1570_v17 = vld [vmem:[%s2065_s2] sm:$0xff]  ;;  %v86_v41 = vld [vmem:[%s2063_s0 + $0x8] sm:$0xff]  ;;  %v87_v5 = vld [vmem:[%s2063_s0 + $0x10] sm:$0xff] }
  0x12   :  { %169 = vmatpush.msra.mxu1 %v1458_v3  ;;  %490 = vmatpush.msrb.mxu0 %v1438_v0  ;;  %v1654_v19 = vld [vmem:[%s2066_s3] ss:$0 sm:$0xff]  ;;  %v1120_v31 = vld [vmem:[%s2070_s7 + $0x68] sm:$0xff] }
  0x13   :  { %223 = vmatpush.msra.mxu2 %v1458_v3  ;;  %277 = vmatpush.msra.mxu3 %v1458_v3 }
  0x14   :  { %170 = vmatpush.msra.mxu1 %v1471_v6  ;;  %491 = vmatpush.msrb.mxu0 %v1443_v1 }
  0x15   :  { %224 = vmatpush.msra.mxu2 %v1471_v6  ;;  %278 = vmatpush.msra.mxu3 %v1471_v6 }
  0x16   :  { %171 = vmatpush.msra.mxu1 %v1480_v7  ;;  %492 = vmatpush.msrb.mxu0 %v1450_v2 }
  0x17   :  { %225 = vmatpush.msra.mxu2 %v1480_v7  ;;  %279 = vmatpush.msra.mxu3 %v1480_v7 }
  0x18   :  { %172 = vmatpush.msra.mxu1 %v1489_v8  ;;  %493 = vmatpush.msrb.mxu0 %v1458_v3 }
  0x19   :  { %226 = vmatpush.msra.mxu2 %v1489_v8  ;;  %280 = vmatpush.msra.mxu3 %v1489_v8 }
  0x1a   :  { %173 = vmatpush.msra.mxu1 %v1498_v9  ;;  %494 = vmatpush.msrb.mxu0 %v1471_v6 }
  0x1b   :  { %227 = vmatpush.msra.mxu2 %v1498_v9  ;;  %281 = vmatpush.msra.mxu3 %v1498_v9 }
  0x1c   :  { %174 = vmatpush.msra.mxu1 %v1507_v10  ;;  %495 = vmatpush.msrb.mxu0 %v1480_v7 }
  0x1d   :  { %228 = vmatpush.msra.mxu2 %v1507_v10  ;;  %282 = vmatpush.msra.mxu3 %v1507_v10 }
  0x1e   :  { %175 = vmatpush.msra.mxu1 %v1516_v11  ;;  %496 = vmatpush.msrb.mxu0 %v1489_v8 }
  0x1f   :  { %229 = vmatpush.msra.mxu2 %v1516_v11  ;;  %283 = vmatpush.msra.mxu3 %v1516_v11 }
  0x20   :  { %176 = vmatpush.msra.mxu1 %v1525_v12  ;;  %497 = vmatpush.msrb.mxu0 %v1498_v9 }
  0x21   :  { %230 = vmatpush.msra.mxu2 %v1525_v12  ;;  %284 = vmatpush.msra.mxu3 %v1525_v12 }
  0x22   :  { %177 = vmatpush.msra.mxu1 %v1534_v13  ;;  %498 = vmatpush.msrb.mxu0 %v1507_v10 }
  0x23   :  { %231 = vmatpush.msra.mxu2 %v1534_v13  ;;  %285 = vmatpush.msra.mxu3 %v1534_v13 }
  0x24   :  { %178 = vmatpush.msra.mxu1 %v1543_v14  ;;  %499 = vmatpush.msrb.mxu0 %v1516_v11 }
  0x25   :  { %232 = vmatpush.msra.mxu2 %v1543_v14  ;;  %286 = vmatpush.msra.mxu3 %v1543_v14 }
  0x26   :  { %179 = vmatpush.msra.mxu1 %v1552_v15  ;;  %500 = vmatpush.msrb.mxu0 %v1525_v12 }
  0x27   :  { %233 = vmatpush.msra.mxu2 %v1552_v15  ;;  %287 = vmatpush.msra.mxu3 %v1552_v15 }
  0x28   :  { %180 = vmatpush.msra.mxu1 %v1561_v16  ;;  %501 = vmatpush.msrb.mxu0 %v1534_v13 }
  0x29   :  { %234 = vmatpush.msra.mxu2 %v1561_v16  ;;  %288 = vmatpush.msra.mxu3 %v1561_v16 }
  0x2a   :  { %181 = vmatpush.msra.mxu1 %v1570_v17  ;;  %502 = vmatpush.msrb.mxu0 %v1543_v14 }
  0x2b   :  { %182 = vmatmul.f32.vlgmr.msra.gmra.mxu1 %v1375_v18  ;;  %235 = vmatpush.msra.mxu2 %v1570_v17 }
  0x2c   :  { %289 = vmatpush.msra.mxu3 %v1570_v17  ;;  %328 = vmatpush.msrb.mxu1 %v1438_v0 }
  0x2d   :  { %382 = vmatpush.msrb.mxu2 %v1438_v0  ;;  %503 = vmatpush.msrb.mxu0 %v1552_v15 }
  0x2e   :  { %436 = vmatpush.msrb.mxu3 %v1438_v0  ;;  %329 = vmatpush.msrb.mxu1 %v1443_v1 }
  0x2f   :  { %383 = vmatpush.msrb.mxu2 %v1443_v1  ;;  %504 = vmatpush.msrb.mxu0 %v1561_v16 }
  0x30   :  { %437 = vmatpush.msrb.mxu3 %v1443_v1  ;;  %330 = vmatpush.msrb.mxu1 %v1450_v2 }
  0x31   :  { %384 = vmatpush.msrb.mxu2 %v1450_v2  ;;  %505 = vmatpush.msrb.mxu0 %v1570_v17 }
  0x32   :  { %438 = vmatpush.msrb.mxu3 %v1450_v2  ;;  %331 = vmatpush.msrb.mxu1 %v1458_v3 }
  0x33   :  { %385 = vmatpush.msrb.mxu2 %v1458_v3  ;;  %1156 = vmatmul.msk.f32.gmra.mxu0 %vm96_vm1, %v86_v41 }
  0x34   :  { %439 = vmatpush.msrb.mxu3 %v1458_v3  ;;  %332 = vmatpush.msrb.mxu1 %v1471_v6 }
  0x35   :  { %386 = vmatpush.msrb.mxu2 %v1471_v6 }
  0x36   :  { %440 = vmatpush.msrb.mxu3 %v1471_v6  ;;  %333 = vmatpush.msrb.mxu1 %v1480_v7 }
  0x37   :  { %387 = vmatpush.msrb.mxu2 %v1480_v7 }
  0x38   :  { %441 = vmatpush.msrb.mxu3 %v1480_v7  ;;  %334 = vmatpush.msrb.mxu1 %v1489_v8 }
  0x39   :  { %388 = vmatpush.msrb.mxu2 %v1489_v8 }
  0x3a   :  { %442 = vmatpush.msrb.mxu3 %v1489_v8  ;;  %335 = vmatpush.msrb.mxu1 %v1498_v9 }
  0x3b   :  { %389 = vmatpush.msrb.mxu2 %v1498_v9  ;;  %1157 = vmatmul.msk.f32.gmra.mxu0 %vm96_vm1, %v87_v5  ;;  %v609_v5 = vld [vmem:[#allocation3 + $0x58] sm:$0xff] }
  0x3c   :  { %443 = vmatpush.msrb.mxu3 %v1498_v9  ;;  %336 = vmatpush.msrb.mxu1 %v1507_v10 }
  0x3d   :  { %390 = vmatpush.msrb.mxu2 %v1507_v10 }
  0x3e   :  { %444 = vmatpush.msrb.mxu3 %v1507_v10  ;;  %337 = vmatpush.msrb.mxu1 %v1516_v11 }
  0x3f   :  { %391 = vmatpush.msrb.mxu2 %v1516_v11 }
  0x40   :  { %445 = vmatpush.msrb.mxu3 %v1516_v11  ;;  %338 = vmatpush.msrb.mxu1 %v1525_v12 }
  0x41   :  { %392 = vmatpush.msrb.mxu2 %v1525_v12 }
  0x42   :  { %446 = vmatpush.msrb.mxu3 %v1525_v12  ;;  %339 = vmatpush.msrb.mxu1 %v1534_v13 }
  0x43   :  { %393 = vmatpush.msrb.mxu2 %v1534_v13 }
  0x44   :  { %447 = vmatpush.msrb.mxu3 %v1534_v13  ;;  %340 = vmatpush.msrb.mxu1 %v1543_v14 }
  0x45   :  { %394 = vmatpush.msrb.mxu2 %v1543_v14 }
  0x46   :  { %448 = vmatpush.msrb.mxu3 %v1543_v14  ;;  %341 = vmatpush.msrb.mxu1 %v1552_v15 }
  0x47   :  { %395 = vmatpush.msrb.mxu2 %v1552_v15 }
  0x48   :  { %449 = vmatpush.msrb.mxu3 %v1552_v15  ;;  %342 = vmatpush.msrb.mxu1 %v1561_v16 }
  0x49   :  { %396 = vmatpush.msrb.mxu2 %v1561_v16 }
  0x4a   :  { %450 = vmatpush.msrb.mxu3 %v1561_v16  ;;  %343 = vmatpush.msrb.mxu1 %v1570_v17 }
  0x4b   :  { %397 = vmatpush.msrb.mxu2 %v1570_v17 }
  0x4c   :  { %451 = vmatpush.msrb.mxu3 %v1570_v17  ;;  %544 = vmatpush.msra.mxu1 %v1438_v0 }
  0x4e   :  { %545 = vmatpush.msra.mxu1 %v1443_v1 }
  0x50   :  { %546 = vmatpush.msra.mxu1 %v1450_v2 }
  0x52   :  { %547 = vmatpush.msra.mxu1 %v1458_v3 }
  0x54   :  { %548 = vmatpush.msra.mxu1 %v1471_v6 }
  0x56   :  { %549 = vmatpush.msra.mxu1 %v1480_v7 }
  0x58   :  { %550 = vmatpush.msra.mxu1 %v1489_v8 }
  0x5a   :  { %551 = vmatpush.msra.mxu1 %v1498_v9 }
  0x5c   :  { %552 = vmatpush.msra.mxu1 %v1507_v10 }
  0x5e   :  { %553 = vmatpush.msra.mxu1 %v1516_v11 }
  0x60   :  { %554 = vmatpush.msra.mxu1 %v1525_v12 }
  0x62   :  { %555 = vmatpush.msra.mxu1 %v1534_v13 }
  0x64   :  { %556 = vmatpush.msra.mxu1 %v1543_v14 }
  0x66   :  { %557 = vmatpush.msra.mxu1 %v1552_v15 }
  0x68   :  { %558 = vmatpush.msra.mxu1 %v1561_v16 }
  0x6a   :  { %559 = vmatpush.msra.mxu1 %v1570_v17 }
  0x8d   :  { %v142_v20 = vpop.f32.mrf.mxu0 }
  0x8e   :  { %v143_v21 = vadd.f32 %v1654_v19, %v142_v20 }
  0xa8   :  { %v183_v22 = vpop.f32.mrf.mxu1 }
  0xa9   :  { %v186_v23 = vadd.f32 %v183_v22, %v143_v21 }
  0xab   :  { %v1163_v24 = vmul.f32 -1.442695, %v186_v23 }
  0xad   :  { %1190 = vpow2.f32 %v1163_v24 }
  0xb0   :  { %v145_v50 = vpop.f32.mrf.mxu0 }
  0xb1   :  { %v146_v51 = vadd.f32 %v1654_v19, %v145_v50 }
  0xb3   :  { %v1191_v25 = vpop.eup %1190 }
  0xb4   :  { %v190_v26 = vadd.f32 1.0, %v1191_v25 }
  0xb6   :  { %1192 = vrcp.f32 %v190_v26  ;;  %v202_v32 = vand.u32 2147483648, %v190_v26  ;;  %v200_v34 = vand.u32 2147483647, %v190_v26  ;;  %vm196_vm3 = vweird.f32 %v190_v26 }
  0xb7   :  { %1194 = vtanh.f32 %v186_v23 }
  0xb8   :  { %v203_v36 = vor.u32 1.1754944e-38, %v202_v32  ;;  %vm201_vm6 = vcmp.eq.f32.partialorder %v200_v34, 8.507059e+37  ;;  %v148_v14 = vpop.f32.mrf.mxu0 }
  0xb9   :  { %v149_v15 = vadd.f32 %v1654_v19, %v148_v14  ;;  %v601_v14 = vld [vmem:[#allocation3 + $0x18] sm:$0xff] }
  0xbc   :  { %v1193_v27 = vpop.eup %1192 }
  0xbd   :  { %v192_v29 = vmul.f32 %v1193_v27, %v190_v26  ;;  %vm197_vm2 = vweird.f32 %v1193_v27  ;;  %v1195_v38 = vpop.eup %1194 }
  0xbe   :  { %vm198_vm5 = vmor %vm196_vm3, %vm197_vm2 }
  0xbf   :  { %v193_v30 = vsub.f32 1.0, %v192_v29 }
  0xc1   :  { %v194_v33 = vmul.f32 %v1193_v27, %v193_v30 }
  0xc3   :  { %v195_v35 = vadd.f32 %v1193_v27, %v194_v33 }
  0xc5   :  { %v199_v37 = vsel %vm198_vm5, %v1193_v27, %v195_v35 }
  0xc6   :  { %v204_v39 = vsel %vm201_vm6, %v203_v36, %v199_v37  ;;  %v88_v36 = vld [vmem:[%s2063_s0 + $0x18] sm:$0xff] }
  0xc7   :  { %v207_v40 = vsel %vm66_vm4, %v204_v39, %v1195_v38  ;;  %1158 = vmatmul.msk.f32.gmra.mxu0 %vm96_vm1, %v88_v36 }
  0xc8   :  { %210 = vrot.lane.b32.xlu1 %v207_v40, %s1376_s11  ;;  %208 = vrot.lane.b32.xlu0 %v207_v40, %s1377_s1 }
  0xd0   :  { %212 = vrot.lane.b32.xlu0 %v207_v40, %s1378_s12 }
 0x13a   :  { %v209_v42 = vpop.permute.xlu0 %208  ;;  %v211_v48 = vpop.permute.xlu1 %210 }
 0x13b   :  { %v214_v44 = vmul.f32 0.0, %v209_v42 }
 0x142   :  { %v213_v43 = vpop.permute.xlu0 %212 }
 0x143   :  { %v215_v45 = vmul.f32 %v213_v43, %v207_v40 }
 0x145   :  { %v216_v46 = vadd.f32 %v215_v45, %v214_v44  ;;  %v151_v45 = vpop.f32.mrf.mxu0 }
 0x147   :  { %1196 = vtanh.f32 %v216_v46 }
 0x14d   :  { %v1197_v47 = vpop.eup %1196 }
 0x14e   :  { %v1669_v49 = vmul.f32 %v1197_v47, %v211_v48 }
 0x150   :  { %236 = vmatmul.f32.vlgmr.msra.gmra.mxu2 %v1669_v49 }
 0x1d3   :  { %v237_v52 = vpop.f32.mrf.mxu2 }
 0x1d4   :  { %v240_v53 = vadd.f32 %v237_v52, %v146_v51 }
 0x1d6   :  { %v1164_v54 = vmul.f32 -1.442695, %v240_v53 }
 0x1d8   :  { %1198 = vpow2.f32 %v1164_v54 }
 0x1de   :  { %v1199_v55 = vpop.eup %1198 }
 0x1df   :  { %v244_v56 = vadd.f32 1.0, %v1199_v55 }
 0x1e1   :  { %1200 = vrcp.f32 %v244_v56  ;;  %v256_v60 = vand.u32 2147483648, %v244_v56  ;;  %v254_v62 = vand.u32 2147483647, %v244_v56  ;;  %vm250_vm8 = vweird.f32 %v244_v56 }
 0x1e2   :  { %1202 = vtanh.f32 %v240_v53 }
 0x1e3   :  { %v257_v0 = vor.u32 1.1754944e-38, %v256_v60  ;;  %vm255_vm10 = vcmp.eq.f32.partialorder %v254_v62, 8.507059e+37 }
 0x1e7   :  { %v1201_v57 = vpop.eup %1200 }
 0x1e8   :  { %v246_v58 = vmul.f32 %v1201_v57, %v244_v56  ;;  %vm251_vm7 = vweird.f32 %v1201_v57  ;;  %v1203_v2 = vpop.eup %1202 }
 0x1e9   :  { %vm252_vm9 = vmor %vm250_vm8, %vm251_vm7 }
 0x1ea   :  { %v247_v59 = vsub.f32 1.0, %v246_v58 }
 0x1ec   :  { %v248_v61 = vmul.f32 %v1201_v57, %v247_v59 }
 0x1ee   :  { %v249_v63 = vadd.f32 %v1201_v57, %v248_v61 }
 0x1f0   :  { %v253_v1 = vsel %vm252_vm9, %v1201_v57, %v249_v63 }
 0x1f1   :  { %v258_v3 = vsel %vm255_vm10, %v257_v0, %v253_v1  ;;  %v613_v1 = vld [vmem:[#allocation3 + $0x78] sm:$0xff] }
 0x1f2   :  { %v261_v4 = vsel %vm66_vm4, %v258_v3, %v1203_v2  ;;  %v612_v2 = vld [vmem:[#allocation3 + $0x70] sm:$0xff]  ;;  %642 = vmatpush.msra.mxu2 %v613_v1  ;;  %v611_v3 = vld [vmem:[#allocation3 + $0x68] sm:$0xff] }
 0x1f3   :  { %266 = vrot.lane.b32.xlu2 %v261_v4, %s1378_s12  ;;  %262 = vrot.lane.b32.xlu1 %v261_v4, %s1377_s1 }
 0x1f4   :  { %643 = vmatpush.msra.mxu2 %v612_v2 }
 0x1f6   :  { %644 = vmatpush.msra.mxu2 %v611_v3 }
 0x1fb   :  { %264 = vrot.lane.b32.xlu2 %v261_v4, %s1376_s11 }
 0x24d   :  { %v267_v6 = vpop.permute.xlu2 %266 }
 0x24e   :  { %v269_v8 = vmul.f32 %v267_v6, %v261_v4  ;;  %v610_v4 = vld [vmem:[#allocation3 + $0x60] sm:$0xff]  ;;  %v608_v6 = vld [vmem:[#allocation3 + $0x50] sm:$0xff] }
 0x24f   :  { %645 = vmatpush.msra.mxu2 %v610_v4 }
 0x251   :  { %646 = vmatpush.msra.mxu2 %v609_v5 }
 0x253   :  { %647 = vmatpush.msra.mxu2 %v608_v6 }
 0x255   :  { %v265_v12 = vpop.permute.xlu2 %264 }
 0x265   :  { %v263_v7 = vpop.permute.xlu1 %262 }
 0x266   :  { %v268_v9 = vmul.f32 %v263_v7, %v216_v46  ;;  %v152_v46 = vadd.f32 %v1654_v19, %v151_v45  ;;  %v607_v7 = vld [vmem:[#allocation3 + $0x48] sm:$0xff] }
 0x267   :  { %648 = vmatpush.msra.mxu2 %v607_v7 }
 0x268   :  { %v270_v10 = vadd.f32 %v269_v8, %v268_v9  ;;  %v606_v8 = vld [vmem:[#allocation3 + $0x40] sm:$0xff]  ;;  %v605_v9 = vld [vmem:[#allocation3 + $0x38] sm:$0xff] }
 0x269   :  { %649 = vmatpush.msra.mxu2 %v606_v8 }
 0x26a   :  { %1204 = vtanh.f32 %v270_v10 }
 0x26b   :  { %650 = vmatpush.msra.mxu2 %v605_v9 }
 0x270   :  { %v1205_v11 = vpop.eup %1204 }
 0x271   :  { %v1682_v13 = vmul.f32 %v1205_v11, %v265_v12  ;;  %v603_v11 = vld [vmem:[#allocation3 + $0x28] sm:$0xff]  ;;  %v602_v12 = vld [vmem:[#allocation3 + $0x20] sm:$0xff] }
 0x273   :  { %290 = vmatmul.f32.vlgmr.msra.gmra.mxu3 %v1682_v13 }
 0x2f6   :  { %v291_v16 = vpop.f32.mrf.mxu3 }
 0x2f7   :  { %v294_v17 = vadd.f32 %v291_v16, %v149_v15  ;;  %v600_v15 = vld [vmem:[#allocation3 + $0x10] sm:$0xff]  ;;  %v89_v16 = vld [vmem:[%s2063_s0 + $0x20] sm:$0xff] }
 0x2f8   :  { %1159 = vmatmul.msk.f32.gmra.mxu0 %vm96_vm1, %v89_v16 }
 0x2f9   :  { %v1165_v20 = vmul.f32 -1.442695, %v294_v17 }
 0x2fb   :  { %1206 = vpow2.f32 %v1165_v20  ;;  %v598_v20 = vld [vmem:[#allocation3] sm:$0xff] }
 0x301   :  { %v1207_v21 = vpop.eup %1206 }
 0x302   :  { %v298_v22 = vadd.f32 1.0, %v1207_v21 }
 0x304   :  { %1208 = vrcp.f32 %v298_v22  ;;  %v310_v26 = vand.u32 2147483648, %v298_v22  ;;  %v308_v28 = vand.u32 2147483647, %v298_v22  ;;  %vm304_vm12 = vweird.f32 %v298_v22 }
 0x305   :  { %1210 = vtanh.f32 %v294_v17  ;;  %v599_v17 = vld [vmem:[#allocation3 + $0x8] sm:$0xff] }
 0x306   :  { %v311_v30 = vor.u32 1.1754944e-38, %v310_v26  ;;  %vm309_vm14 = vcmp.eq.f32.partialorder %v308_v28, 8.507059e+37 }
 0x30a   :  { %v1209_v23 = vpop.eup %1208 }
 0x30b   :  { %v300_v24 = vmul.f32 %v1209_v23, %v298_v22  ;;  %vm305_vm11 = vweird.f32 %v1209_v23  ;;  %v1211_v33 = vpop.eup %1210 }
 0x30c   :  { %vm306_vm13 = vmor %vm304_vm12, %vm305_vm11 }
 0x30d   :  { %v301_v25 = vsub.f32 1.0, %v300_v24 }
 0x30f   :  { %v302_v27 = vmul.f32 %v1209_v23, %v301_v25 }
 0x311   :  { %v303_v29 = vadd.f32 %v1209_v23, %v302_v27 }
 0x313   :  { %v307_v32 = vsel %vm306_vm13, %v1209_v23, %v303_v29 }
 0x314   :  { %v312_v34 = vsel %vm309_vm14, %v311_v30, %v307_v32 }
 0x315   :  { %v315_v35 = vsel %vm66_vm4, %v312_v34, %v1211_v33 }
 0x316   :  { %318 = vrot.lane.b32.xlu2 %v315_v35, %s1376_s11  ;;  %320 = vrot.lane.b32.xlu1 %v315_v35, %s1378_s12 }
 0x317   :  { %316 = vrot.lane.b32.xlu0 %v315_v35, %s1377_s1 }
 0x370   :  { %v319_v43 = vpop.permute.xlu2 %318 }
 0x375   :  { %v154_v29 = vpop.f32.mrf.mxu0 }
 0x376   :  { %v155_v30 = vadd.f32 %v1654_v19, %v154_v29 }
 0x388   :  { %v321_v37 = vpop.permute.xlu1 %320 }
 0x389   :  { %v323_v38 = vmul.f32 %v321_v37, %v315_v35  ;;  %v317_v39 = vpop.permute.xlu0 %316 }
 0x38a   :  { %v322_v40 = vmul.f32 %v317_v39, %v270_v10  ;;  %v604_v10 = vld [vmem:[#allocation3 + $0x30] sm:$0xff] }
 0x38b   :  { %651 = vmatpush.msra.mxu2 %v604_v10 }
 0x38c   :  { %v1695_v41 = vadd.f32 %v323_v38, %v322_v40 }
 0x38d   :  { %652 = vmatpush.msra.mxu2 %v603_v11 }
 0x38e   :  { %1212 = vtanh.f32 %v1695_v41 }
 0x38f   :  { %653 = vmatpush.msra.mxu2 %v602_v12  ;;  %v1871_v12 = vld [vmem:[%s2069_s6] ss:$0 sm:$0xff] }
 0x391   :  { %654 = vmatpush.msra.mxu2 %v601_v14 }
 0x393   :  { %655 = vmatpush.msra.mxu2 %v600_v15 }
 0x394   :  { %v1213_v42 = vpop.eup %1212 }
 0x395   :  { %v1698_v44 = vmul.f32 %v1213_v42, %v319_v43  ;;  %656 = vmatpush.msra.mxu2 %v599_v17 }
 0x397   :  { %344 = vmatmul.f32.vlgmr.msrb.gmra.mxu1 %v1698_v44  ;;  %657 = vmatpush.msra.mxu2 %v598_v20 }
 0x414   :  { %v345_v47 = vpop.f32.mrf.mxu1 }
 0x415   :  { %v348_v48 = vadd.f32 %v345_v47, %v152_v46  ;;  %v1729_v47 = vld [vmem:[#allocation5 + $0x78] sm:$0xff] }
 0x416   :  { %683 = vmatpush.msra.mxu3 %v1729_v47  ;;  %736 = vmatpush.msra.mxu0 %v1729_v47 }
 0x417   :  { %v1166_v50 = vmul.f32 -1.442695, %v348_v48  ;;  %789 = vmatpush.msrb.mxu1 %v1729_v47 }
 0x419   :  { %1214 = vpow2.f32 %v1166_v50  ;;  %v1735_v50 = vld [vmem:[#allocation5 + $0x68] sm:$0xff] }
 0x41f   :  { %v1215_v51 = vpop.eup %1214 }
 0x420   :  { %v352_v52 = vadd.f32 1.0, %v1215_v51  ;;  %v1741_v51 = vld [vmem:[#allocation5 + $0x60] sm:$0xff] }
 0x422   :  { %1216 = vrcp.f32 %v352_v52  ;;  %v364_v56 = vand.u32 2147483648, %v352_v52  ;;  %v362_v58 = vand.u32 2147483647, %v352_v52  ;;  %vm358_vm0 = vweird.f32 %v352_v52 }
 0x423   :  { %1218 = vtanh.f32 %v348_v48  ;;  %v1731_v48 = vld [vmem:[#allocation5 + $0x70] sm:$0xff] }
 0x424   :  { %v365_v60 = vor.u32 1.1754944e-38, %v364_v56  ;;  %vm363_vm3 = vcmp.eq.f32.partialorder %v362_v58, 8.507059e+37  ;;  %684 = vmatpush.msra.mxu3 %v1731_v48  ;;  %737 = vmatpush.msra.mxu0 %v1731_v48  ;;  %v1774_v56 = vld [vmem:[#allocation5 + $0x38] sm:$0xff]  ;;  %v1783_v58 = vld [vmem:[#allocation5 + $0x28] sm:$0xff] }
 0x425   :  { %790 = vmatpush.msrb.mxu1 %v1731_v48 }
 0x426   :  { %685 = vmatpush.msra.mxu3 %v1735_v50  ;;  %738 = vmatpush.msra.mxu0 %v1735_v50 }
 0x427   :  { %791 = vmatpush.msrb.mxu1 %v1735_v50 }
 0x428   :  { %v1217_v53 = vpop.eup %1216  ;;  %686 = vmatpush.msra.mxu3 %v1741_v51  ;;  %739 = vmatpush.msra.mxu0 %v1741_v51 }
 0x429   :  { %v354_v54 = vmul.f32 %v1217_v53, %v352_v52  ;;  %vm359_vm15 = vweird.f32 %v1217_v53  ;;  %v1219_v62 = vpop.eup %1218  ;;  %v1747_v52 = vld [vmem:[#allocation5 + $0x58] sm:$0xff]  ;;  %792 = vmatpush.msrb.mxu1 %v1741_v51 }
 0x42a   :  { %vm360_vm2 = vmor %vm358_vm0, %vm359_vm15  ;;  %687 = vmatpush.msra.mxu3 %v1747_v52  ;;  %740 = vmatpush.msra.mxu0 %v1747_v52 }
 0x42b   :  { %v355_v55 = vsub.f32 1.0, %v354_v54  ;;  %793 = vmatpush.msrb.mxu1 %v1747_v52  ;;  %v1763_v54 = vld [vmem:[#allocation5 + $0x48] sm:$0xff] }
 0x42d   :  { %v356_v57 = vmul.f32 %v1217_v53, %v355_v55  ;;  %v1769_v55 = vld [vmem:[#allocation5 + $0x40] sm:$0xff] }
 0x42f   :  { %v357_v59 = vadd.f32 %v1217_v53, %v356_v57  ;;  %v1777_v57 = vld [vmem:[#allocation5 + $0x30] sm:$0xff] }
 0x431   :  { %v361_v61 = vsel %vm360_vm2, %v1217_v53, %v357_v59  ;;  %v1759_v53 = vld [vmem:[#allocation5 + $0x50] sm:$0xff]  ;;  %v1789_v59 = vld [vmem:[#allocation5 + $0x20] sm:$0xff] }
 0x432   :  { %v366_v63 = vsel %vm363_vm3, %v365_v60, %v361_v61  ;;  %688 = vmatpush.msra.mxu3 %v1759_v53  ;;  %741 = vmatpush.msra.mxu0 %v1759_v53  ;;  %v1799_v60 = vld [vmem:[#allocation5 + $0x18] sm:$0xff]  ;;  %v1801_v61 = vld [vmem:[#allocation5 + $0x10] sm:$0xff] }
 0x433   :  { %v369_v0 = vsel %vm66_vm4, %v366_v63, %v1219_v62  ;;  %794 = vmatpush.msrb.mxu1 %v1759_v53  ;;  %v90_v62 = vld [vmem:[%s2063_s0 + $0x28] sm:$0xff] }
 0x434   :  { %372 = vrot.lane.b32.xlu2 %v369_v0, %s1376_s11  ;;  %374 = vrot.lane.b32.xlu1 %v369_v0, %s1378_s12  ;;  %v1810_v63 = vld [vmem:[#allocation5 + $0x8] sm:$0xff] }
 0x435   :  { %370 = vrot.lane.b32.xlu0 %v369_v0, %s1377_s1  ;;  %689 = vmatpush.msra.mxu3 %v1763_v54 }
 0x436   :  { %742 = vmatpush.msra.mxu0 %v1763_v54  ;;  %795 = vmatpush.msrb.mxu1 %v1763_v54 }
 0x437   :  { %690 = vmatpush.msra.mxu3 %v1769_v55  ;;  %1160 = vmatmul.msk.f32.gmra.mxu0 %vm96_vm1, %v90_v62 }
 0x438   :  { %743 = vmatpush.msra.mxu0 %v1769_v55  ;;  %796 = vmatpush.msrb.mxu1 %v1769_v55 }
 0x439   :  { %691 = vmatpush.msra.mxu3 %v1774_v56 }
 0x43a   :  { %744 = vmatpush.msra.mxu0 %v1774_v56  ;;  %797 = vmatpush.msrb.mxu1 %v1774_v56 }
 0x43b   :  { %692 = vmatpush.msra.mxu3 %v1777_v57 }
 0x43c   :  { %745 = vmatpush.msra.mxu0 %v1777_v57  ;;  %798 = vmatpush.msrb.mxu1 %v1777_v57 }
 0x43d   :  { %693 = vmatpush.msra.mxu3 %v1783_v58 }
 0x43e   :  { %746 = vmatpush.msra.mxu0 %v1783_v58  ;;  %799 = vmatpush.msrb.mxu1 %v1783_v58 }
 0x43f   :  { %694 = vmatpush.msra.mxu3 %v1789_v59 }
 0x440   :  { %747 = vmatpush.msra.mxu0 %v1789_v59  ;;  %800 = vmatpush.msrb.mxu1 %v1789_v59 }
 0x441   :  { %695 = vmatpush.msra.mxu3 %v1799_v60 }
 0x442   :  { %748 = vmatpush.msra.mxu0 %v1799_v60  ;;  %801 = vmatpush.msrb.mxu1 %v1799_v60 }
 0x443   :  { %696 = vmatpush.msra.mxu3 %v1801_v61 }
 0x444   :  { %749 = vmatpush.msra.mxu0 %v1801_v61  ;;  %802 = vmatpush.msrb.mxu1 %v1801_v61 }
 0x445   :  { %697 = vmatpush.msra.mxu3 %v1810_v63 }
 0x446   :  { %750 = vmatpush.msra.mxu0 %v1810_v63  ;;  %803 = vmatpush.msrb.mxu1 %v1810_v63 }
 0x48e   :  { %v373_v27 = vpop.permute.xlu2 %372 }
 0x4a6   :  { %v375_v21 = vpop.permute.xlu1 %374 }
 0x4a7   :  { %v377_v22 = vmul.f32 %v375_v21, %v369_v0  ;;  %v371_v23 = vpop.permute.xlu0 %370  ;;  %v1816_v0 = vld [vmem:[#allocation5] sm:$0xff] }
 0x4a8   :  { %v376_v24 = vmul.f32 %v371_v23, %v1695_v41  ;;  %698 = vmatpush.msra.mxu3 %v1816_v0  ;;  %751 = vmatpush.msra.mxu0 %v1816_v0 }
 0x4a9   :  { %804 = vmatpush.msrb.mxu1 %v1816_v0 }
 0x4aa   :  { %v1712_v25 = vadd.f32 %v377_v22, %v376_v24 }
 0x4ac   :  { %1220 = vtanh.f32 %v1712_v25 }
 0x4b2   :  { %v1221_v26 = vpop.eup %1220 }
 0x4b3   :  { %v380_v28 = vmul.f32 %v1221_v26, %v373_v27 }
 0x4b5   :  { %398 = vmatmul.f32.vlgmr.msrb.gmra.mxu2 %v380_v28 }
 0x4b6   :  { %1001 = vmatpush.msrb.mxu2 %v1729_v47 }
 0x4b8   :  { %1002 = vmatpush.msrb.mxu2 %v1731_v48 }
 0x4ba   :  { %1003 = vmatpush.msrb.mxu2 %v1735_v50 }
 0x4bc   :  { %1004 = vmatpush.msrb.mxu2 %v1741_v51 }
 0x4bd   :  { %658 = vmatmul.f32.vlgmr.msra.gmra.mxu2 %v1669_v49 }
 0x4be   :  { %1005 = vmatpush.msrb.mxu2 %v1747_v52 }
 0x4c0   :  { %1006 = vmatpush.msrb.mxu2 %v1759_v53 }
 0x4c2   :  { %1007 = vmatpush.msrb.mxu2 %v1763_v54 }
 0x4c4   :  { %1008 = vmatpush.msrb.mxu2 %v1769_v55 }
 0x4c5   :  { %661 = vmatmul.f32.gmra.mxu2 %v1682_v13 }
 0x4c6   :  { %1009 = vmatpush.msrb.mxu2 %v1774_v56 }
 0x4c8   :  { %1010 = vmatpush.msrb.mxu2 %v1777_v57 }
 0x4ca   :  { %1011 = vmatpush.msrb.mxu2 %v1783_v58 }
 0x4cc   :  { %1012 = vmatpush.msrb.mxu2 %v1789_v59 }
 0x4cd   :  { %664 = vmatmul.f32.gmra.mxu2 %v1698_v44 }
 0x4ce   :  { %1013 = vmatpush.msrb.mxu2 %v1799_v60 }
 0x4d0   :  { %1014 = vmatpush.msrb.mxu2 %v1801_v61 }
 0x4d2   :  { %1015 = vmatpush.msrb.mxu2 %v1810_v63 }
 0x4d4   :  { %1016 = vmatpush.msrb.mxu2 %v1816_v0 }
 0x4d5   :  { %667 = vmatmul.f32.gmra.mxu2 %v380_v28 }
 0x538   :  { %v399_v32 = vpop.f32.mrf.mxu2 }
 0x539   :  { %v402_v33 = vadd.f32 %v399_v32, %v155_v30 }
 0x53b   :  { %v1167_v34 = vmul.f32 -1.442695, %v402_v33 }
 0x53d   :  { %1222 = vpow2.f32 %v1167_v34 }
 0x540   :  { %v659_v15 = vpop.f32.mrf.mxu2 }
 0x541   :  { %v660_v16 = vadd.f32 %v1871_v12, %v659_v15 }
 0x543   :  { %v1223_v35 = vpop.eup %1222 }
 0x544   :  { %v406_v36 = vadd.f32 1.0, %v1223_v35 }
 0x546   :  { %1224 = vrcp.f32 %v406_v36  ;;  %v418_v49 = vand.u32 2147483648, %v406_v36  ;;  %v416_v13 = vand.u32 2147483647, %v406_v36  ;;  %vm412_vm6 = vweird.f32 %v406_v36 }
 0x547   :  { %1226 = vtanh.f32 %v402_v33 }
 0x548   :  { %v419_v42 = vor.u32 1.1754944e-38, %v418_v49  ;;  %vm417_vm8 = vcmp.eq.f32.partialorder %v416_v13, 8.507059e+37 }
 0x54c   :  { %v1225_v37 = vpop.eup %1224 }
 0x54d   :  { %v408_v38 = vmul.f32 %v1225_v37, %v406_v36  ;;  %vm413_vm5 = vweird.f32 %v1225_v37  ;;  %v1227_v44 = vpop.eup %1226 }
 0x54e   :  { %vm414_vm7 = vmor %vm412_vm6, %vm413_vm5 }
 0x54f   :  { %v409_v39 = vsub.f32 1.0, %v408_v38 }
 0x551   :  { %v410_v40 = vmul.f32 %v1225_v37, %v409_v39 }
 0x553   :  { %v411_v41 = vadd.f32 %v1225_v37, %v410_v40 }
 0x555   :  { %v415_v43 = vsel %vm414_vm7, %v1225_v37, %v411_v41 }
 0x556   :  { %v420_v45 = vsel %vm417_vm8, %v419_v42, %v415_v43 }
 0x557   :  { %v1721_v46 = vsel %vm66_vm4, %v420_v45, %v1227_v44 }
 0x558   :  { %426 = vrot.lane.b32.xlu2 %v1721_v46, %s1376_s11  ;;  %428 = vrot.lane.b32.xlu1 %v1721_v46, %s1378_s12 }
 0x559   :  { %424 = vrot.lane.b32.xlu0 %v1721_v46, %s1377_s1 }
 0x5b2   :  { %v427_v7 = vpop.permute.xlu2 %426 }
 0x5ca   :  { %v429_v1 = vpop.permute.xlu1 %428 }
 0x5cb   :  { %v431_v2 = vmul.f32 %v429_v1, %v1721_v46  ;;  %v425_v3 = vpop.permute.xlu0 %424 }
 0x5cc   :  { %v430_v4 = vmul.f32 %v425_v3, %v1712_v25  ;;  %v92_v3 = vld [vmem:[%s2063_s0 + $0x38] sm:$0xff] }
 0x5ce   :  { %v1831_v5 = vadd.f32 %v431_v2, %v430_v4  ;;  %v91_v2 = vld [vmem:[%s2063_s0 + $0x30] sm:$0xff] }
 0x5cf   :  { %1161 = vmatmul.msk.f32.gmra.mxu0 %vm96_vm1, %v91_v2 }
 0x5d0   :  { %1228 = vtanh.f32 %v1831_v5 }
 0x5d6   :  { %v1229_v6 = vpop.eup %1228 }
 0x5d7   :  { %v434_v8 = vmul.f32 %v1229_v6, %v427_v7  ;;  %1162 = vmatmul.msk.f32.gmra.mxu0 %vm96_vm1, %v92_v3 }
 0x5d9   :  { %452 = vmatmul.f32.vlgmr.msrb.gmra.mxu3 %v434_v8  ;;  %670 = vmatmul.f32.gmra.mxu2 %v434_v8 }
 0x5da   :  { %842 = vmatpush.msrb.mxu3 %v1729_v47 }
 0x5dc   :  { %843 = vmatpush.msrb.mxu3 %v1731_v48 }
 0x5de   :  { %844 = vmatpush.msrb.mxu3 %v1735_v50 }
 0x5e0   :  { %845 = vmatpush.msrb.mxu3 %v1741_v51 }
 0x5e1   :  { %699 = vmatmul.f32.vlgmr.msra.gmra.mxu3 %v1375_v18  ;;  %v157_v18 = vpop.f32.mrf.mxu0 }
 0x5e2   :  { %846 = vmatpush.msrb.mxu3 %v1747_v52  ;;  %v158_v9 = vadd.f32 %v1654_v19, %v157_v18 }
 0x5e4   :  { %847 = vmatpush.msrb.mxu3 %v1759_v53 }
 0x5e6   :  { %848 = vmatpush.msrb.mxu3 %v1763_v54 }
 0x5e8   :  { %849 = vmatpush.msrb.mxu3 %v1769_v55 }
 0x5ea   :  { %850 = vmatpush.msrb.mxu3 %v1774_v56 }
 0x5ec   :  { %851 = vmatpush.msrb.mxu3 %v1777_v57 }
 0x5ee   :  { %852 = vmatpush.msrb.mxu3 %v1783_v58 }
 0x5f0   :  { %853 = vmatpush.msrb.mxu3 %v1789_v59 }
 0x5f2   :  { %854 = vmatpush.msrb.mxu3 %v1799_v60 }
 0x5f4   :  { %855 = vmatpush.msrb.mxu3 %v1801_v61 }
 0x5f6   :  { %856 = vmatpush.msrb.mxu3 %v1810_v63 }
 0x5f8   :  { %857 = vmatpush.msrb.mxu3 %v1816_v0 }
 0x5fa   :  { %1054 = vmatpush.msra.mxu3 %v1729_v47 }
 0x5fc   :  { %1055 = vmatpush.msra.mxu3 %v1731_v48 }
 0x5fe   :  { %1056 = vmatpush.msra.mxu3 %v1735_v50 }
 0x600   :  { %1057 = vmatpush.msra.mxu3 %v1741_v51 }
 0x602   :  { %1058 = vmatpush.msra.mxu3 %v1747_v52 }
 0x604   :  { %1059 = vmatpush.msra.mxu3 %v1759_v53 }
 0x606   :  { %1060 = vmatpush.msra.mxu3 %v1763_v54 }
 0x608   :  { %1061 = vmatpush.msra.mxu3 %v1769_v55 }
 0x60a   :  { %1062 = vmatpush.msra.mxu3 %v1774_v56 }
 0x60c   :  { %1063 = vmatpush.msra.mxu3 %v1777_v57 }
 0x60e   :  { %1064 = vmatpush.msra.mxu3 %v1783_v58 }
 0x610   :  { %1065 = vmatpush.msra.mxu3 %v1789_v59 }
 0x612   :  { %1066 = vmatpush.msra.mxu3 %v1799_v60 }
 0x614   :  { %1067 = vmatpush.msra.mxu3 %v1801_v61 }
 0x616   :  { %1068 = vmatpush.msra.mxu3 %v1810_v63 }
 0x618   :  { %1069 = vmatpush.msra.mxu3 %v1816_v0 }
 0x65c   :  { %v453_v10 = vpop.f32.mrf.mxu3 }
 0x65d   :  { %v456_v11 = vadd.f32 %v453_v10, %v158_v9 }
 0x65f   :  { %v1168_v14 = vmul.f32 -1.442695, %v456_v11 }
 0x661   :  { %1230 = vpow2.f32 %v1168_v14 }
 0x664   :  { %v700_v17 = vpop.f32.mrf.mxu3 }
 0x665   :  { %v703_v20 = vadd.f32 %v700_v17, %v660_v16 }
 0x667   :  { %v1231_v21 = vpop.eup %1230  ;;  %v1171_v22 = vmul.f32 -1.442695, %v703_v20 }
 0x668   :  { %v460_v23 = vadd.f32 1.0, %v1231_v21 }
 0x669   :  { %1232 = vpow2.f32 %v1171_v22 }
 0x66a   :  { %1234 = vrcp.f32 %v460_v23  ;;  %v472_v29 = vand.u32 2147483648, %v460_v23  ;;  %v470_v32 = vand.u32 2147483647, %v460_v23  ;;  %vm466_vm10 = vweird.f32 %v460_v23 }
 0x66c   :  { %v473_v35 = vor.u32 1.1754944e-38, %v472_v29  ;;  %vm471_vm12 = vcmp.eq.f32.partialorder %v470_v32, 8.507059e+37  ;;  %v662_v29 = vpop.f32.mrf.mxu2 }
 0x66f   :  { %v1233_v24 = vpop.eup %1232 }
 0x670   :  { %v1235_v25 = vpop.eup %1234  ;;  %v707_v26 = vadd.f32 1.0, %v1233_v24 }
 0x671   :  { %v462_v27 = vmul.f32 %v1235_v25, %v460_v23  ;;  %vm467_vm9 = vweird.f32 %v1235_v25  ;;  %v160_v23 = vpop.f32.mrf.mxu0 }
 0x672   :  { %1236 = vrcp.f32 %v707_v26  ;;  %vm468_vm11 = vmor %vm466_vm10, %vm467_vm9  ;;  %v719_v13 = vand.u32 2147483648, %v707_v26  ;;  %v717_v42 = vand.u32 2147483647, %v707_v26  ;;  %vm713_vm14 = vweird.f32 %v707_v26 }
 0x673   :  { %v463_v28 = vsub.f32 1.0, %v462_v27  ;;  %1238 = vtanh.f32 %v456_v11 }
 0x674   :  { %1240 = vtanh.f32 %v703_v20  ;;  %v720_v44 = vor.u32 1.1754944e-38, %v719_v13  ;;  %vm718_vm0 = vcmp.eq.f32.partialorder %v717_v42, 8.507059e+37 }
 0x675   :  { %v464_v30 = vmul.f32 %v1235_v25, %v463_v28 }
 0x677   :  { %v465_v33 = vadd.f32 %v1235_v25, %v464_v30  ;;  %v663_v30 = vadd.f32 %v1871_v12, %v662_v29 }
 0x678   :  { %v1237_v34 = vpop.eup %1236 }
 0x679   :  { %v469_v36 = vsel %vm468_vm11, %v1235_v25, %v465_v33  ;;  %v709_v37 = vmul.f32 %v1237_v34, %v707_v26  ;;  %v1239_v38 = vpop.eup %1238  ;;  %vm714_vm13 = vweird.f32 %v1237_v34  ;;  %v1915_v24 = vpop.f32.mrf.mxu0  ;;  %v161_v25 = vadd.f32 %v1654_v19, %v160_v23 }
 0x67a   :  { %v474_v39 = vsel %vm471_vm12, %v473_v35, %v469_v36  ;;  %vm715_vm15 = vmor %vm713_vm14, %vm714_vm13  ;;  %v1241_v46 = vpop.eup %1240 }
 0x67b   :  { %v477_v49 = vsel %vm66_vm4, %v474_v39, %v1239_v38  ;;  %v710_v40 = vsub.f32 1.0, %v709_v37 }
 0x67c   :  { %482 = vrot.lane.b32.xlu1 %v477_v49, %s1378_s12  ;;  %478 = vrot.lane.b32.xlu0 %v477_v49, %s1377_s1 }
 0x67d   :  { %v711_v41 = vmul.f32 %v1237_v34, %v710_v40 }
 0x67f   :  { %v712_v43 = vadd.f32 %v1237_v34, %v711_v41 }
 0x681   :  { %v716_v45 = vsel %vm715_vm15, %v1237_v34, %v712_v43 }
 0x682   :  { %v721_v62 = vsel %vm718_vm0, %v720_v44, %v716_v45 }
 0x683   :  { %v724_v1 = vsel %vm66_vm4, %v721_v62, %v1241_v46 }
 0x684   :  { %725 = vrot.lane.b32.xlu2 %v724_v1, %s1377_s1  ;;  %480 = vrot.lane.b32.xlu1 %v477_v49, %s1376_s11 }
 0x685   :  { %729 = vrot.lane.b32.xlu0 %v724_v1, %s1378_s12 }
 0x68c   :  { %727 = vrot.lane.b32.xlu2 %v724_v1, %s1376_s11 }
 0x6de   :  { %v726_v9 = vpop.permute.xlu2 %725 }
 0x6df   :  { %v731_v11 = vmul.f32 0.0, %v726_v9 }
 0x6e6   :  { %v728_v21 = vpop.permute.xlu2 %727 }
 0x6ee   :  { %v483_v4 = vpop.permute.xlu1 %482  ;;  %v479_v6 = vpop.permute.xlu0 %478 }
 0x6ef   :  { %v485_v7 = vmul.f32 %v483_v4, %v477_v49  ;;  %v484_v8 = vmul.f32 %v479_v6, %v1831_v5 }
 0x6f1   :  { %v1893_v18 = vadd.f32 %v485_v7, %v484_v8 }
 0x6f3   :  { %1242 = vtanh.f32 %v1893_v18 }
 0x6f6   :  { %v481_v16 = vpop.permute.xlu1 %480 }
 0x6f7   :  { %v730_v10 = vpop.permute.xlu0 %729 }
 0x6f8   :  { %v732_v14 = vmul.f32 %v730_v10, %v724_v1 }
 0x6f9   :  { %v1243_v15 = vpop.eup %1242 }
 0x6fa   :  { %v488_v17 = vmul.f32 %v1243_v15, %v481_v16  ;;  %v1896_v20 = vadd.f32 %v732_v14, %v731_v11 }
 0x6fc   :  { %1244 = vtanh.f32 %v1896_v20  ;;  %506 = vmatmul.f32.vlgmr.msrb.gmra.mxu0 %v488_v17  ;;  %673 = vmatmul.f32.gmra.mxu2 %v488_v17 }
 0x6fd   :  { %895 = vmatpush.msrb.mxu0 %v1729_v47 }
 0x6ff   :  { %896 = vmatpush.msrb.mxu0 %v1731_v48 }
 0x701   :  { %897 = vmatpush.msrb.mxu0 %v1735_v50 }
 0x702   :  { %v1245_v5 = vpop.eup %1244 }
 0x703   :  { %v735_v22 = vmul.f32 %v1245_v5, %v728_v21  ;;  %898 = vmatpush.msrb.mxu0 %v1741_v51 }
 0x705   :  { %752 = vmatmul.f32.vlgmr.msra.gmra.mxu0 %v735_v22 }
 0x706   :  { %899 = vmatpush.msrb.mxu0 %v1747_v52 }
 0x708   :  { %900 = vmatpush.msrb.mxu0 %v1759_v53 }
 0x70a   :  { %901 = vmatpush.msrb.mxu0 %v1763_v54 }
 0x70c   :  { %902 = vmatpush.msrb.mxu0 %v1769_v55 }
 0x70e   :  { %903 = vmatpush.msrb.mxu0 %v1774_v56 }
 0x710   :  { %904 = vmatpush.msrb.mxu0 %v1777_v57 }
 0x712   :  { %905 = vmatpush.msrb.mxu0 %v1783_v58 }
 0x714   :  { %906 = vmatpush.msrb.mxu0 %v1789_v59 }
 0x716   :  { %907 = vmatpush.msrb.mxu0 %v1799_v60 }
 0x718   :  { %908 = vmatpush.msrb.mxu0 %v1801_v61 }
 0x71a   :  { %909 = vmatpush.msrb.mxu0 %v1810_v63 }
 0x71c   :  { %910 = vmatpush.msrb.mxu0 %v1816_v0 }
 0x779   :  { %v507_v26 = vpop.f32.mrf.mxu0 }
 0x77a   :  { %v510_v27 = vadd.f32 %v507_v26, %v161_v25 }
 0x77c   :  { %v1169_v28 = vmul.f32 -1.442695, %v510_v27 }
 0x77e   :  { %1246 = vpow2.f32 %v1169_v28 }
 0x782   :  { %v753_v32 = vpop.f32.mrf.mxu0 }
 0x783   :  { %v756_v33 = vadd.f32 %v753_v32, %v663_v30 }
 0x784   :  { %v1247_v34 = vpop.eup %1246 }
 0x785   :  { %v514_v35 = vadd.f32 1.0, %v1247_v34  ;;  %v1172_v36 = vmul.f32 -1.442695, %v756_v33 }
 0x787   :  { %1248 = vrcp.f32 %v514_v35  ;;  %v526_v40 = vand.u32 2147483648, %v514_v35  ;;  %v524_v41 = vand.u32 2147483647, %v514_v35  ;;  %vm520_vm3 = vweird.f32 %v514_v35 }
 0x788   :  { %1250 = vpow2.f32 %v1172_v36 }
 0x789   :  { %1252 = vtanh.f32 %v510_v27  ;;  %v527_v43 = vor.u32 1.1754944e-38, %v526_v40  ;;  %vm525_vm6 = vcmp.eq.f32.partialorder %v524_v41, 8.507059e+37 }
 0x78d   :  { %v1249_v37 = vpop.eup %1248 }
 0x78e   :  { %v1251_v38 = vpop.eup %1250  ;;  %v516_v39 = vmul.f32 %v1249_v37, %v514_v35  ;;  %vm521_vm2 = vweird.f32 %v1249_v37 }
 0x78f   :  { %v760_v49 = vadd.f32 1.0, %v1251_v38  ;;  %vm522_vm5 = vmor %vm520_vm3, %vm521_vm2  ;;  %v1253_v44 = vpop.eup %1252 }
 0x790   :  { %v517_v19 = vsub.f32 1.0, %v516_v39 }
 0x791   :  { %1254 = vrcp.f32 %v760_v49  ;;  %v772_v4 = vand.u32 2147483648, %v760_v49  ;;  %v770_v7 = vand.u32 2147483647, %v760_v49  ;;  %vm766_vm8 = vweird.f32 %v760_v49 }
 0x792   :  { %v518_v13 = vmul.f32 %v1249_v37, %v517_v19  ;;  %1256 = vtanh.f32 %v756_v33 }
 0x793   :  { %v773_v9 = vor.u32 1.1754944e-38, %v772_v4  ;;  %vm771_vm10 = vcmp.eq.f32.partialorder %v770_v7, 8.507059e+37 }
 0x794   :  { %v519_v42 = vadd.f32 %v1249_v37, %v518_v13 }
 0x796   :  { %v523_v45 = vsel %vm522_vm5, %v1249_v37, %v519_v42 }
 0x797   :  { %v1255_v46 = vpop.eup %1254  ;;  %v528_v62 = vsel %vm525_vm6, %v527_v43, %v523_v45 }
 0x798   :  { %v531_v1 = vsel %vm66_vm4, %v528_v62, %v1253_v44  ;;  %v762_v2 = vmul.f32 %v1255_v46, %v760_v49  ;;  %vm767_vm7 = vweird.f32 %v1255_v46  ;;  %v1257_v11 = vpop.eup %1256 }
 0x799   :  { %536 = vrot.lane.b32.xlu1 %v531_v1, %s1378_s12  ;;  %532 = vrot.lane.b32.xlu0 %v531_v1, %s1377_s1  ;;  %vm768_vm9 = vmor %vm766_vm8, %vm767_vm7 }
 0x79a   :  { %v763_v3 = vsub.f32 1.0, %v762_v2 }
 0x79c   :  { %v764_v6 = vmul.f32 %v1255_v46, %v763_v3 }
 0x79e   :  { %v765_v8 = vadd.f32 %v1255_v46, %v764_v6 }
 0x7a0   :  { %v769_v10 = vsel %vm768_vm9, %v1255_v46, %v765_v8 }
 0x7a1   :  { %534 = vrot.lane.b32.xlu1 %v531_v1, %s1376_s11  ;;  %v774_v14 = vsel %vm771_vm10, %v773_v9, %v769_v10 }
 0x7a2   :  { %v777_v15 = vsel %vm66_vm4, %v774_v14, %v1257_v11 }
 0x7a3   :  { %782 = vrot.lane.b32.xlu0 %v777_v15, %s1378_s12  ;;  %778 = vrot.lane.b32.xlu2 %v777_v15, %s1377_s1 }
 0x7ab   :  { %780 = vrot.lane.b32.xlu2 %v777_v15, %s1376_s11 }
 0x7fd   :  { %v779_v23 = vpop.permute.xlu2 %778 }
 0x7fe   :  { %v784_v27 = vmul.f32 %v779_v23, %v1896_v20 }
 0x805   :  { %v781_v33 = vpop.permute.xlu2 %780 }
 0x80b   :  { %v537_v16 = vpop.permute.xlu1 %536  ;;  %v533_v17 = vpop.permute.xlu0 %532 }
 0x80c   :  { %v539_v5 = vmul.f32 %v537_v16, %v531_v1  ;;  %v538_v21 = vmul.f32 %v533_v17, %v1893_v18 }
 0x80e   :  { %v1930_v22 = vadd.f32 %v539_v5, %v538_v21 }
 0x810   :  { %1258 = vtanh.f32 %v1930_v22 }
 0x813   :  { %v535_v28 = vpop.permute.xlu1 %534 }
 0x815   :  { %v783_v25 = vpop.permute.xlu0 %782 }
 0x816   :  { %v1259_v26 = vpop.eup %1258  ;;  %v785_v29 = vmul.f32 %v783_v25, %v777_v15 }
 0x817   :  { %v542_v30 = vmul.f32 %v1259_v26, %v535_v28 }
 0x818   :  { %v786_v32 = vadd.f32 %v785_v29, %v784_v27 }
 0x819   :  { %560 = vmatmul.f32.vlgmr.msra.gmra.mxu1 %v542_v30  ;;  %676 = vmatmul.f32.gmra.mxu2 %v542_v30 }
 0x81a   :  { %1260 = vtanh.f32 %v786_v32  ;;  %948 = vmatpush.msra.mxu1 %v1729_v47  ;;  %v1318_v47 = vld [vmem:[%s2066_s3] ss:$0 sm:$0xff] }
 0x81c   :  { %949 = vmatpush.msra.mxu1 %v1731_v48  ;;  %v164_v48 = vadd.f32 %v1318_v47, %v1915_v24 }
 0x81e   :  { %950 = vmatpush.msra.mxu1 %v1735_v50 }
 0x820   :  { %v1261_v18 = vpop.eup %1260  ;;  %951 = vmatpush.msra.mxu1 %v1741_v51 }
 0x821   :  { %v788_v34 = vmul.f32 %v1261_v18, %v781_v33 }
 0x822   :  { %952 = vmatpush.msra.mxu1 %v1747_v52  ;;  %v665_v52 = vpop.f32.mrf.mxu2 }
 0x823   :  { %805 = vmatmul.f32.vlgmr.msrb.gmra.mxu1 %v788_v34 }
 0x824   :  { %953 = vmatpush.msra.mxu1 %v1759_v53  ;;  %v666_v53 = vadd.f32 %v1871_v12, %v665_v52 }
 0x826   :  { %954 = vmatpush.msra.mxu1 %v1763_v54 }
 0x828   :  { %955 = vmatpush.msra.mxu1 %v1769_v55 }
 0x82a   :  { %956 = vmatpush.msra.mxu1 %v1774_v56  ;;  %v668_v45 = vpop.f32.mrf.mxu2 }
 0x82b   :  { %v669_v46 = vadd.f32 %v1871_v12, %v668_v45 }
 0x82c   :  { %957 = vmatpush.msra.mxu1 %v1777_v57 }
 0x82e   :  { %958 = vmatpush.msra.mxu1 %v1783_v58 }
 0x830   :  { %959 = vmatpush.msra.mxu1 %v1789_v59 }
 0x832   :  { %960 = vmatpush.msra.mxu1 %v1799_v60  ;;  %v671_v33 = vpop.f32.mrf.mxu2 }
 0x833   :  { %v672_v34 = vadd.f32 %v1871_v12, %v671_v33 }
 0x834   :  { %961 = vmatpush.msra.mxu1 %v1801_v61 }
 0x836   :  { %962 = vmatpush.msra.mxu1 %v1810_v63 }
 0x838   :  { %963 = vmatpush.msra.mxu1 %v1816_v0 }
 0x896   :  { %v561_v50 = vpop.f32.mrf.mxu1 }
 0x897   :  { %v1954_v51 = vadd.f32 %v561_v50, %v164_v48 }
 0x899   :  { %v1170_v18 = vmul.f32 -1.442695, %v1954_v51 }
 0x8a0   :  { %v806_v54 = vpop.f32.mrf.mxu1 }
 0x8a1   :  { %v809_v55 = vadd.f32 %v806_v54, %v666_v53 }
 0x8a3   :  { %v1173_v56 = vmul.f32 -1.442695, %v809_v55 }
 0x8a5   :  { %1262 = vpow2.f32 %v1173_v56 }
 0x8ab   :  { %v1263_v57 = vpop.eup %1262 }
 0x8ac   :  { %v813_v58 = vadd.f32 1.0, %v1263_v57 }
 0x8ae   :  { %1264 = vrcp.f32 %v813_v58  ;;  %v825_v63 = vand.u32 2147483648, %v813_v58  ;;  %v823_v20 = vand.u32 2147483647, %v813_v58  ;;  %vm819_vm12 = vweird.f32 %v813_v58 }
 0x8af   :  { %1266 = vtanh.f32 %v809_v55 }
 0x8b0   :  { %v826_v35 = vor.u32 1.1754944e-38, %v825_v63  ;;  %vm824_vm14 = vcmp.eq.f32.partialorder %v823_v20, 8.507059e+37 }
 0x8b4   :  { %v1265_v59 = vpop.eup %1264 }
 0x8b5   :  { %v815_v60 = vmul.f32 %v1265_v59, %v813_v58  ;;  %vm820_vm11 = vweird.f32 %v1265_v59  ;;  %v1267_v37 = vpop.eup %1266 }
 0x8b6   :  { %vm821_vm13 = vmor %vm819_vm12, %vm820_vm11 }
 0x8b7   :  { %v816_v61 = vsub.f32 1.0, %v815_v60 }
 0x8b9   :  { %v817_v0 = vmul.f32 %v1265_v59, %v816_v61 }
 0x8bb   :  { %v818_v24 = vadd.f32 %v1265_v59, %v817_v0 }
 0x8bd   :  { %v822_v36 = vsel %vm821_vm13, %v1265_v59, %v818_v24 }
 0x8be   :  { %v827_v38 = vsel %vm824_vm14, %v826_v35, %v822_v36 }
 0x8bf   :  { %v830_v39 = vsel %vm66_vm4, %v827_v38, %v1267_v37 }
 0x8c0   :  { %833 = vrot.lane.b32.xlu2 %v830_v39, %s1376_s11  ;;  %835 = vrot.lane.b32.xlu1 %v830_v39, %s1378_s12 }
 0x8c1   :  { %831 = vrot.lane.b32.xlu0 %v830_v39, %s1377_s1 }
 0x91a   :  { %v834_v43 = vpop.permute.xlu2 %833 }
 0x932   :  { %v836_v49 = vpop.permute.xlu1 %835 }
 0x933   :  { %v838_v19 = vmul.f32 %v836_v49, %v830_v39  ;;  %v832_v40 = vpop.permute.xlu0 %831 }
 0x934   :  { %v837_v13 = vmul.f32 %v832_v40, %v786_v32 }
 0x936   :  { %v839_v41 = vadd.f32 %v838_v19, %v837_v13 }
 0x938   :  { %1268 = vtanh.f32 %v839_v41 }
 0x93e   :  { %v1269_v42 = vpop.eup %1268 }
 0x93f   :  { %v841_v44 = vmul.f32 %v1269_v42, %v834_v43 }
 0x941   :  { %858 = vmatmul.f32.vlgmr.msrb.gmra.mxu3 %v841_v44 }
 0x9c4   :  { %v859_v62 = vpop.f32.mrf.mxu3 }
 0x9c5   :  { %v862_v1 = vadd.f32 %v859_v62, %v669_v46 }
 0x9c7   :  { %v1174_v2 = vmul.f32 -1.442695, %v862_v1 }
 0x9c9   :  { %1270 = vpow2.f32 %v1174_v2 }
 0x9cf   :  { %v1271_v3 = vpop.eup %1270 }
 0x9d0   :  { %v866_v4 = vadd.f32 1.0, %v1271_v3 }
 0x9d2   :  { %1272 = vrcp.f32 %v866_v4  ;;  %v878_v9 = vand.u32 2147483648, %v866_v4  ;;  %v876_v11 = vand.u32 2147483647, %v866_v4  ;;  %vm872_vm0 = vweird.f32 %v866_v4 }
 0x9d3   :  { %1274 = vtanh.f32 %v862_v1 }
 0x9d4   :  { %v879_v15 = vor.u32 1.1754944e-38, %v878_v9  ;;  %vm877_vm3 = vcmp.eq.f32.partialorder %v876_v11, 8.507059e+37 }
 0x9d8   :  { %v1273_v6 = vpop.eup %1272 }
 0x9d9   :  { %v868_v7 = vmul.f32 %v1273_v6, %v866_v4  ;;  %vm873_vm15 = vweird.f32 %v1273_v6  ;;  %v1275_v17 = vpop.eup %1274 }
 0x9da   :  { %vm874_vm2 = vmor %vm872_vm0, %vm873_vm15 }
 0x9db   :  { %v869_v8 = vsub.f32 1.0, %v868_v7 }
 0x9dd   :  { %v870_v10 = vmul.f32 %v1273_v6, %v869_v8 }
 0x9df   :  { %v871_v14 = vadd.f32 %v1273_v6, %v870_v10 }
 0x9e1   :  { %v875_v16 = vsel %vm874_vm2, %v1273_v6, %v871_v14 }
 0x9e2   :  { %v880_v5 = vsel %vm877_vm3, %v879_v15, %v875_v16 }
 0x9e3   :  { %v883_v21 = vsel %vm66_vm4, %v880_v5, %v1275_v17  ;;  %v674_v17 = vpop.f32.mrf.mxu2 }
 0x9e4   :  { %886 = vrot.lane.b32.xlu2 %v883_v21, %s1376_s11  ;;  %888 = vrot.lane.b32.xlu1 %v883_v21, %s1378_s12  ;;  %v675_v5 = vadd.f32 %v1871_v12, %v674_v17 }
 0x9e5   :  { %884 = vrot.lane.b32.xlu0 %v883_v21, %s1377_s1 }
 0xa3e   :  { %v887_v30 = vpop.permute.xlu2 %886 }
 0xa56   :  { %v889_v23 = vpop.permute.xlu1 %888 }
 0xa57   :  { %v891_v25 = vmul.f32 %v889_v23, %v883_v21  ;;  %v885_v26 = vpop.permute.xlu0 %884 }
 0xa58   :  { %v890_v27 = vmul.f32 %v885_v26, %v839_v41 }
 0xa5a   :  { %v1968_v28 = vadd.f32 %v891_v25, %v890_v27 }
 0xa5c   :  { %1276 = vtanh.f32 %v1968_v28 }
 0xa5d   :  { %1278 = vpow2.f32 %v1170_v18 }
 0xa62   :  { %v1277_v29 = vpop.eup %1276 }
 0xa63   :  { %v894_v32 = vmul.f32 %v1277_v29, %v887_v30  ;;  %v1279_v48 = vpop.eup %1278 }
 0xa64   :  { %v568_v53 = vadd.f32 1.0, %v1279_v48 }
 0xa65   :  { %911 = vmatmul.f32.vlgmr.msrb.gmra.mxu0 %v894_v32 }
 0xa66   :  { %v580_v19 = vand.u32 2147483648, %v568_v53  ;;  %vm574_vm10 = vweird.f32 %v568_v53  ;;  %v578_v13 = vand.u32 2147483647, %v568_v53 }
 0xa68   :  { %v581_v42 = vor.u32 1.1754944e-38, %v580_v19  ;;  %vm579_vm12 = vcmp.eq.f32.partialorder %v578_v13, 8.507059e+37 }
 0xae2   :  { %v912_v47 = vpop.f32.mrf.mxu0 }
 0xae3   :  { %v915_v50 = vadd.f32 %v912_v47, %v672_v34 }
 0xae5   :  { %v1175_v52 = vmul.f32 -1.442695, %v915_v50 }
 0xae7   :  { %1280 = vpow2.f32 %v1175_v52 }
 0xae8   :  { %1282 = vrcp.f32 %v568_v53 }
 0xaed   :  { %v1281_v54 = vpop.eup %1280 }
 0xaee   :  { %v919_v55 = vadd.f32 1.0, %v1281_v54  ;;  %v1283_v56 = vpop.eup %1282 }
 0xaef   :  { %v570_v57 = vmul.f32 %v1283_v56, %v568_v53  ;;  %vm575_vm9 = vweird.f32 %v1283_v56 }
 0xaf0   :  { %1284 = vrcp.f32 %v919_v55  ;;  %v931_v63 = vand.u32 2147483648, %v919_v55  ;;  %v929_v20 = vand.u32 2147483647, %v919_v55  ;;  %vm925_vm6 = vweird.f32 %v919_v55  ;;  %vm576_vm11 = vmor %vm574_vm10, %vm575_vm9 }
 0xaf1   :  { %v571_v60 = vsub.f32 1.0, %v570_v57  ;;  %1286 = vtanh.f32 %v915_v50 }
 0xaf2   :  { %v932_v36 = vor.u32 1.1754944e-38, %v931_v63  ;;  %vm930_vm8 = vcmp.eq.f32.partialorder %v929_v20, 8.507059e+37  ;;  %1288 = vtanh.f32 %v1954_v51 }
 0xaf3   :  { %v572_v24 = vmul.f32 %v1283_v56, %v571_v60 }
 0xaf5   :  { %v573_v38 = vadd.f32 %v1283_v56, %v572_v24 }
 0xaf6   :  { %v1285_v58 = vpop.eup %1284 }
 0xaf7   :  { %v921_v59 = vmul.f32 %v1285_v58, %v919_v55  ;;  %vm926_vm5 = vweird.f32 %v1285_v58  ;;  %v1287_v39 = vpop.eup %1286  ;;  %v577_v41 = vsel %vm576_vm11, %v1283_v56, %v573_v38 }
 0xaf8   :  { %vm927_vm7 = vmor %vm925_vm6, %vm926_vm5  ;;  %v582_v43 = vsel %vm579_vm12, %v581_v42, %v577_v41  ;;  %v1289_v44 = vpop.eup %1288 }
 0xaf9   :  { %v922_v61 = vsub.f32 1.0, %v921_v59  ;;  %v585_v45 = vsel %vm66_vm4, %v582_v43, %v1289_v44 }
 0xafb   :  { %v923_v0 = vmul.f32 %v1285_v58, %v922_v61  ;;  %v677_v61 = vpop.f32.mrf.mxu2 }
 0xafd   :  { %v924_v35 = vadd.f32 %v1285_v58, %v923_v0  ;;  %v678_v0 = vadd.f32 %v1871_v12, %v677_v61 }
 0xaff   :  { %v928_v37 = vsel %vm927_vm7, %v1285_v58, %v924_v35 }
 0xb00   :  { %v933_v49 = vsel %vm930_vm8, %v932_v36, %v928_v37 }
 0xb01   :  { %v936_v40 = vsel %vm66_vm4, %v933_v49, %v1287_v39 }
 0xb02   :  { %939 = vrot.lane.b32.xlu2 %v936_v40, %s1376_s11  ;;  %941 = vrot.lane.b32.xlu1 %v936_v40, %s1378_s12 }
 0xb03   :  { %937 = vrot.lane.b32.xlu0 %v936_v40, %s1377_s1 }
 0xb0a   :  { %590 = vrot.lane.b32.xlu1 %v585_v45, %s1378_s12 }
 0xb0b   :  { %586 = vrot.lane.b32.xlu0 %v585_v45, %s1377_s1 }
 0xb12   :  { %588 = vrot.lane.b32.xlu1 %v585_v45, %s1376_s11 }
 0xb5c   :  { %v940_v9 = vpop.permute.xlu2 %939 }
 0xb74   :  { %v942_v51 = vpop.permute.xlu1 %941 }
 0xb75   :  { %v944_v46 = vmul.f32 %v942_v51, %v936_v40  ;;  %v938_v62 = vpop.permute.xlu0 %937 }
 0xb76   :  { %v943_v1 = vmul.f32 %v938_v62, %v1968_v28 }
 0xb78   :  { %v945_v2 = vadd.f32 %v944_v46, %v943_v1 }
 0xb7a   :  { %1290 = vtanh.f32 %v945_v2 }
 0xb7c   :  { %v591_v3 = vpop.permute.xlu1 %590 }
 0xb7d   :  { %v593_v4 = vmul.f32 %v591_v3, %v585_v45  ;;  %v587_v6 = vpop.permute.xlu0 %586 }
 0xb7e   :  { %v592_v7 = vmul.f32 %v587_v6, %v1930_v22 }
 0xb80   :  { %v1291_v8 = vpop.eup %1290  ;;  %v594_v10 = vadd.f32 %v593_v4, %v592_v7 }
 0xb81   :  { %v947_v11 = vmul.f32 %v1291_v8, %v940_v9 }
 0xb82   :  { %1292 = vtanh.f32 %v594_v10 }
 0xb83   :  { %964 = vmatmul.f32.vlgmr.msra.gmra.mxu1 %v947_v11 }
 0xb84   :  { %v589_v15 = vpop.permute.xlu1 %588 }
 0xb88   :  { %v1293_v14 = vpop.eup %1292 }
 0xb89   :  { %v596_v16 = vmul.f32 %v1293_v14, %v589_v15 }
 0xb8b   :  { %679 = vmatmul.f32.gmra.mxu2 %v596_v16 }
 0xc00   :  { %v965_v21 = vpop.f32.mrf.mxu1 }
 0xc01   :  { %v968_v23 = vadd.f32 %v965_v21, %v675_v5 }
 0xc03   :  { %v1176_v25 = vmul.f32 -1.442695, %v968_v23 }
 0xc05   :  { %1294 = vpow2.f32 %v1176_v25 }
 0xc0b   :  { %v1295_v26 = vpop.eup %1294 }
 0xc0c   :  { %v972_v27 = vadd.f32 1.0, %v1295_v26 }
 0xc0e   :  { %1296 = vrcp.f32 %v972_v27  ;;  %v984_v30 = vand.u32 2147483648, %v972_v27  ;;  %v982_v18 = vand.u32 2147483647, %v972_v27  ;;  %vm978_vm14 = vweird.f32 %v972_v27  ;;  %v680_v63 = vpop.f32.mrf.mxu2 }
 0xc0f   :  { %1298 = vtanh.f32 %v968_v23  ;;  %v681_v8 = vadd.f32 %v1871_v12, %v680_v63 }
 0xc10   :  { %v985_v34 = vor.u32 1.1754944e-38, %v984_v30  ;;  %vm983_vm0 = vcmp.eq.f32.partialorder %v982_v18, 8.507059e+37  ;;  %v1122_v30 = vld [vmem:[%s2070_s7 + $0x78] sm:$0xff]  ;;  %v1119_v18 = vld [vmem:[%s2070_s7 + $0x60] sm:$0xff] }
 0xc11   :  { %1127 = vmatpush.msra.mxu0 %v1122_v30 }
 0xc14   :  { %v1297_v22 = vpop.eup %1296 }
 0xc15   :  { %v974_v28 = vmul.f32 %v1297_v22, %v972_v27  ;;  %vm979_vm13 = vweird.f32 %v1297_v22  ;;  %v1299_v48 = vpop.eup %1298 }
 0xc16   :  { %vm980_vm15 = vmor %vm978_vm14, %vm979_vm13 }
 0xc17   :  { %v975_v29 = vsub.f32 1.0, %v974_v28 }
 0xc19   :  { %v976_v32 = vmul.f32 %v1297_v22, %v975_v29 }
 0xc1b   :  { %v977_v33 = vadd.f32 %v1297_v22, %v976_v32  ;;  %v1121_v32 = vld [vmem:[%s2070_s7 + $0x70] sm:$0xff] }
 0xc1c   :  { %1128 = vmatpush.msra.mxu0 %v1121_v32 }
 0xc1d   :  { %v981_v47 = vsel %vm980_vm15, %v1297_v22, %v977_v33  ;;  %v1118_v33 = vld [vmem:[%s2070_s7 + $0x58] sm:$0xff] }
 0xc1e   :  { %v986_v50 = vsel %vm983_vm0, %v985_v34, %v981_v47  ;;  %1129 = vmatpush.msra.mxu0 %v1120_v31  ;;  %v1117_v34 = vld [vmem:[%s2070_s7 + $0x50] sm:$0xff]  ;;  %v1116_v47 = vld [vmem:[%s2070_s7 + $0x48] sm:$0xff] }
 0xc1f   :  { %v989_v52 = vsel %vm66_vm4, %v986_v50, %v1299_v48  ;;  %v1115_v48 = vld [vmem:[%s2070_s7 + $0x40] sm:$0xff]  ;;  %v1114_v50 = vld [vmem:[%s2070_s7 + $0x38] sm:$0xff] }
 0xc20   :  { %994 = vrot.lane.b32.xlu0 %v989_v52, %s1378_s12  ;;  %990 = vrot.lane.b32.xlu2 %v989_v52, %s1377_s1 }
 0xc21   :  { %1130 = vmatpush.msra.mxu0 %v1119_v18 }
 0xc23   :  { %1131 = vmatpush.msra.mxu0 %v1118_v33 }
 0xc25   :  { %1132 = vmatpush.msra.mxu0 %v1117_v34 }
 0xc27   :  { %1133 = vmatpush.msra.mxu0 %v1116_v47 }
 0xc28   :  { %992 = vrot.lane.b32.xlu2 %v989_v52, %s1376_s11 }
 0xc29   :  { %1134 = vmatpush.msra.mxu0 %v1115_v48 }
 0xc2b   :  { %1135 = vmatpush.msra.mxu0 %v1114_v50 }
 0xc7a   :  { %v991_v53 = vpop.permute.xlu2 %990 }
 0xc7b   :  { %v996_v55 = vmul.f32 %v991_v53, %v945_v2  ;;  %v1112_v53 = vld [vmem:[%s2070_s7 + $0x28] sm:$0xff] }
 0xc82   :  { %v993_v59 = vpop.permute.xlu2 %992 }
 0xc92   :  { %v995_v54 = vpop.permute.xlu0 %994 }
 0xc93   :  { %v997_v56 = vmul.f32 %v995_v54, %v989_v52  ;;  %v1113_v52 = vld [vmem:[%s2070_s7 + $0x30] sm:$0xff]  ;;  %v1111_v54 = vld [vmem:[%s2070_s7 + $0x20] sm:$0xff] }
 0xc94   :  { %1136 = vmatpush.msra.mxu0 %v1113_v52 }
 0xc95   :  { %v998_v57 = vadd.f32 %v997_v56, %v996_v55  ;;  %v1110_v55 = vld [vmem:[%s2070_s7 + $0x18] sm:$0xff]  ;;  %v1109_v56 = vld [vmem:[%s2070_s7 + $0x10] sm:$0xff] }
 0xc96   :  { %1137 = vmatpush.msra.mxu0 %v1112_v53 }
 0xc97   :  { %1300 = vtanh.f32 %v998_v57 }
 0xc98   :  { %1138 = vmatpush.msra.mxu0 %v1111_v54 }
 0xc9a   :  { %1139 = vmatpush.msra.mxu0 %v1110_v55 }
 0xc9c   :  { %1140 = vmatpush.msra.mxu0 %v1109_v56 }
 0xc9d   :  { %v1301_v58 = vpop.eup %1300 }
 0xc9e   :  { %v1000_v60 = vmul.f32 %v1301_v58, %v993_v59  ;;  %v1107_v58 = vld [vmem:[%s2070_s7] sm:$0xff] }
 0xca0   :  { %1017 = vmatmul.f32.vlgmr.msrb.gmra.mxu2 %v1000_v60 }
 0xd23   :  { %v1018_v20 = vpop.f32.mrf.mxu2 }
 0xd24   :  { %v1021_v24 = vadd.f32 %v1018_v20, %v678_v0 }
 0xd26   :  { %v1177_v35 = vmul.f32 -1.442695, %v1021_v24 }
 0xd28   :  { %1302 = vpow2.f32 %v1177_v35 }
 0xd2e   :  { %v1303_v36 = vpop.eup %1302 }
 0xd2f   :  { %v1025_v37 = vadd.f32 1.0, %v1303_v36  ;;  %v1189_v36 = vld [vmem:[%s2071_s8] ss:$0 sm:$0xff] }
 0xd31   :  { %1304 = vrcp.f32 %v1025_v37  ;;  %v1037_v19 = vand.u32 2147483648, %v1025_v37  ;;  %v1035_v13 = vand.u32 2147483647, %v1025_v37  ;;  %vm1031_vm3 = vweird.f32 %v1025_v37 }
 0xd32   :  { %1306 = vtanh.f32 %v1021_v24 }
 0xd33   :  { %v1038_v42 = vor.u32 1.1754944e-38, %v1037_v19  ;;  %vm1036_vm6 = vcmp.eq.f32.partialorder %v1035_v13, 8.507059e+37 }
 0xd37   :  { %v1305_v38 = vpop.eup %1304 }
 0xd38   :  { %v1027_v39 = vmul.f32 %v1305_v38, %v1025_v37  ;;  %vm1032_vm2 = vweird.f32 %v1305_v38  ;;  %v1307_v44 = vpop.eup %1306 }
 0xd39   :  { %vm1033_vm5 = vmor %vm1031_vm3, %vm1032_vm2 }
 0xd3a   :  { %v1028_v49 = vsub.f32 1.0, %v1027_v39 }
 0xd3c   :  { %v1029_v40 = vmul.f32 %v1305_v38, %v1028_v49 }
 0xd3e   :  { %v1030_v41 = vadd.f32 %v1305_v38, %v1029_v40 }
 0xd40   :  { %v1034_v43 = vsel %vm1033_vm5, %v1305_v38, %v1030_v41 }
 0xd41   :  { %v1039_v45 = vsel %vm1036_vm6, %v1038_v42, %v1034_v43 }
 0xd42   :  { %v1042_v51 = vsel %vm66_vm4, %v1039_v45, %v1307_v44 }
 0xd43   :  { %1045 = vrot.lane.b32.xlu2 %v1042_v51, %s1376_s11  ;;  %1047 = vrot.lane.b32.xlu1 %v1042_v51, %s1378_s12 }
 0xd44   :  { %1043 = vrot.lane.b32.xlu0 %v1042_v51, %s1377_s1 }
 0xd9d   :  { %v1046_v6 = vpop.permute.xlu2 %1045 }
 0xdb5   :  { %v1048_v46 = vpop.permute.xlu1 %1047 }
 0xdb6   :  { %v1050_v62 = vmul.f32 %v1048_v46, %v1042_v51  ;;  %v1044_v1 = vpop.permute.xlu0 %1043 }
 0xdb7   :  { %v1049_v2 = vmul.f32 %v1044_v1, %v998_v57  ;;  %v1108_v57 = vld [vmem:[%s2070_s7 + $0x8] sm:$0xff] }
 0xdb8   :  { %1141 = vmatpush.msra.mxu0 %v1108_v57 }
 0xdb9   :  { %v1998_v3 = vadd.f32 %v1050_v62, %v1049_v2 }
 0xdba   :  { %1142 = vmatpush.msra.mxu0 %v1107_v58 }
 0xdbb   :  { %1308 = vtanh.f32 %v1998_v3 }
 0xdc1   :  { %v1309_v4 = vpop.eup %1308 }
 0xdc2   :  { %v1053_v7 = vmul.f32 %v1309_v4, %v1046_v6 }
 0xdc4   :  { %1070 = vmatmul.f32.vlgmr.msra.gmra.mxu3 %v1053_v7 }
 0xe47   :  { %v1071_v9 = vpop.f32.mrf.mxu3 }
 0xe48   :  { %v1074_v10 = vadd.f32 %v1071_v9, %v681_v8 }
 0xe4a   :  { %v1178_v11 = vmul.f32 -1.442695, %v1074_v10 }
 0xe4c   :  { %1310 = vpow2.f32 %v1178_v11 }
 0xe52   :  { %v1311_v14 = vpop.eup %1310 }
 0xe53   :  { %v1078_v15 = vadd.f32 1.0, %v1311_v14 }
 0xe55   :  { %1312 = vrcp.f32 %v1078_v15  ;;  %v1090_v21 = vand.u32 2147483648, %v1078_v15  ;;  %v1088_v25 = vand.u32 2147483647, %v1078_v15  ;;  %vm1084_vm8 = vweird.f32 %v1078_v15 }
 0xe56   :  { %1314 = vtanh.f32 %v1074_v10 }
 0xe57   :  { %v1091_v27 = vor.u32 1.1754944e-38, %v1090_v21  ;;  %vm1089_vm10 = vcmp.eq.f32.partialorder %v1088_v25, 8.507059e+37 }
 0xe5b   :  { %v1313_v16 = vpop.eup %1312 }
 0xe5c   :  { %v1080_v17 = vmul.f32 %v1313_v16, %v1078_v15  ;;  %vm1085_vm7 = vweird.f32 %v1313_v16  ;;  %v1315_v22 = vpop.eup %1314 }
 0xe5d   :  { %vm1086_vm9 = vmor %vm1084_vm8, %vm1085_vm7 }
 0xe5e   :  { %v1081_v5 = vsub.f32 1.0, %v1080_v17 }
 0xe60   :  { %v1082_v23 = vmul.f32 %v1313_v16, %v1081_v5 }
 0xe62   :  { %v1083_v26 = vadd.f32 %v1313_v16, %v1082_v23 }
 0xe64   :  { %v1087_v12 = vsel %vm1086_vm9, %v1313_v16, %v1083_v26 }
 0xe65   :  { %v1092_v28 = vsel %vm1089_vm10, %v1091_v27, %v1087_v12 }
 0xe66   :  { %v1095_v29 = vsel %vm66_vm4, %v1092_v28, %v1315_v22 }
 0xe67   :  { %1098 = vrot.lane.b32.xlu2 %v1095_v29, %s1376_s11  ;;  %1100 = vrot.lane.b32.xlu1 %v1095_v29, %s1378_s12 }
 0xe68   :  { %1096 = vrot.lane.b32.xlu0 %v1095_v29, %s1377_s1 }
 0xec1   :  { %v1099_v24 = vpop.permute.xlu2 %1098 }
 0xed9   :  { %v1101_v59 = vpop.permute.xlu1 %1100 }
 0xeda   :  { %v1103_v60 = vmul.f32 %v1101_v59, %v1095_v29  ;;  %v1097_v61 = vpop.permute.xlu0 %1096 }
 0xedb   :  { %v1102_v63 = vmul.f32 %v1097_v61, %v1998_v3 }
 0xedd   :  { %v1104_v0 = vadd.f32 %v1103_v60, %v1102_v63 }
 0xedf   :  { %1316 = vtanh.f32 %v1104_v0 }
 0xee5   :  { %v1317_v20 = vpop.eup %1316 }
 0xee6   :  { %v1106_v35 = vmul.f32 %v1317_v20, %v1099_v24 }
 0xee8   :  { %1143 = vmatmul.f32.vlgmr.msra.gmra.mxu0 %v1106_v35 }
 0xf65   :  { %v1144_v37 = vpop.f32.mrf.mxu0 }
 0xf66   :  { %v1145_v38 = vadd.f32 %v1189_v36, %v1144_v37 }
 0xf68   :  { %1147 = vst.msk [vmem:[%s2072_s9] sm:$0xff] %vm96_vm1, %v1145_v38 }
 0xf69   :  { %1152 = vsyncpa [#allocation4], 1 }
 0xf6a   :  { %1153 = vsyncpa [#allocation6], 1 }

</bundles_post_ra>
